<compile_context>
chip_gen: v6e
topology: v6e:2x2x1
jax: 0.10.0
libtpu: 0.0.40
codegen_flags: <defaults>
</compile_context>

<pallas_src>
import functools

import jax
import jax.numpy as jnp
from jax import lax
from jax.experimental import pallas as pl
from jax.experimental.pallas import tpu as pltpu


def _ece_stats_kernel(logits_ref, labels_ref, stats_ref, *,
                      n_bins, n_total, block_n, n_steps):
    p = pl.program_id(0)   # parallel sample-slice
    s = pl.program_id(1)   # sequential accumulation step within the slice

    @pl.when(s == 0)
    def _():
        stats_ref[...] = jnp.zeros_like(stats_ref)

    logits = logits_ref[...].astype(jnp.float32)              # (TN, C)
    tn, c = logits.shape

    # Unclamped logical block index -> row-validity mask (handles both the
    # ragged last block and clamped/duplicated DMA blocks past the end).
    blk = p * n_steps + s
    row = lax.broadcasted_iota(jnp.int32, (tn, 1), 0) + blk * block_n
    valid = row < n_total                                      # (TN, 1)

    # Confidence = max softmax prob = 1 / sum(exp(l - rowmax)).
    # Row-sum done on the MXU (idle otherwise); max stays on the XLU.
    row_max = jnp.max(logits, axis=1, keepdims=True)           # (TN, 1)
    p_exp = jnp.exp(logits - row_max)                          # (TN, C)
    ones_c = jnp.ones((c, 1), jnp.float32)
    denom = jnp.dot(p_exp, ones_c,
                    precision=lax.Precision.HIGHEST,
                    preferred_element_type=jnp.float32)        # (TN, 1)
    conf = jnp.where(valid, 1.0 / denom, 0.0)                  # (TN, 1)

    # Prediction = first index achieving the row max (matches torch.max).
    col = lax.broadcasted_iota(jnp.int32, (tn, c), 1)
    is_max = logits == row_max
    pred = jnp.min(jnp.where(is_max, col, c), axis=1, keepdims=True)  # (TN,1)
    acc = jnp.where(valid & (pred == labels_ref[...]), 1.0, 0.0)      # (TN,1)

    # Bin membership: bin b is (b/n_bins, (b+1)/n_bins].
    bin_idx = lax.broadcasted_iota(jnp.int32, (1, n_bins), 1).astype(jnp.float32)
    lowers = bin_idx / jnp.float32(n_bins)
    uppers = (bin_idx + 1.0) / jnp.float32(n_bins)
    in_bin_f = ((conf > lowers) & (conf <= uppers) & valid
                ).astype(jnp.float32)                          # (TN, n_bins)

    # One MXU dot produces all three per-bin sums at once:
    #   rows of the result: [count, conf_sum, acc_sum].
    valid_f = valid.astype(jnp.float32)
    stacked = jnp.concatenate([valid_f, conf, acc], axis=1)    # (TN, 3)
    partial = lax.dot_general(
        stacked, in_bin_f,
        dimension_numbers=(((0,), (0,)), ((), ())),            # contract TN
        precision=lax.Precision.HIGHEST,
        preferred_element_type=jnp.float32)                    # (3, n_bins)

    stats_ref[...] += partial[None]


def ece_loss(logits, labels, *, n_bins=15, block_n=1024, n_parallel=2):
    """Pallas implementation of _ECELoss.forward. Returns shape (1,) float32.

    block_n should be a multiple of 16 (works for both f32 and bf16 logits).
    Default 1024 keeps double-buffered VMEM well under the scoped default on
    v5e/v6e/v7x while amortizing per-grid-step overhead.
    """
    n, c = logits.shape
    labels2 = labels.reshape(n, 1).astype(jnp.int32)

    # Don't use a block taller than (padded) N; keep it a multiple of 16.
    block_n = max(16, min(block_n, ((n + 15) // 16) * 16))

    n_blocks = pl.cdiv(n, block_n)
    n_parallel = max(1, min(n_parallel, n_blocks))
    n_steps = pl.cdiv(n_blocks, n_parallel)

    def in_map(p, s):
        # Clamp the DMA block index; rows past n are masked in-kernel.
        return (jnp.minimum(p * n_steps + s, n_blocks - 1), 0)

    kernel = functools.partial(_ece_stats_kernel, n_bins=n_bins, n_total=n,
                               block_n=block_n, n_steps=n_steps)

    partials = pl.pallas_call(
        kernel,
        out_shape=jax.ShapeDtypeStruct((n_parallel, 3, n_bins), jnp.float32),
        grid_spec=pltpu.PrefetchScalarGridSpec(
            num_scalar_prefetch=0,
            grid=(n_parallel, n_steps),
            in_specs=[
                pl.BlockSpec((block_n, c), in_map),
                pl.BlockSpec((block_n, 1), in_map),
            ],
            out_specs=pl.BlockSpec((1, 3, n_bins), lambda p, s: (p, 0, 0)),
        ),
        compiler_params=pltpu.CompilerParams(
            dimension_semantics=("parallel", "arbitrary")),
    )(logits, labels2)

    # Tiny (3 x n_bins) epilogue in plain jnp: fold per-core partials -> ECE.
    stats = jnp.sum(partials, axis=0)                          # (3, n_bins)
    cnt, csum, asum = stats[0], stats[1], stats[2]
    nonempty = cnt > 0.0
    inv_cnt = 1.0 / jnp.where(nonempty, cnt, 1.0)              # shared reciprocal
    gap = jnp.abs((csum - asum) * inv_cnt)
    prop = cnt / jnp.float32(n)
    ece = jnp.sum(jnp.where(nonempty, gap * prop, 0.0))
    return ece.reshape(1)


def ece_reference(logits, labels, n_bins=15):
    """Plain-JAX reference mirroring the torch module."""
    sm = jax.nn.softmax(logits.astype(jnp.float32), axis=1)
    conf = jnp.max(sm, axis=1)
    pred = jnp.argmax(sm, axis=1)
    acc = (pred == labels).astype(jnp.float32)
    bounds = jnp.linspace(0.0, 1.0, n_bins + 1)
    ece = jnp.zeros((1,), jnp.float32)
    for b in range(n_bins):
        in_bin = (conf > bounds[b]) & (conf <= bounds[b + 1])
        in_bin_f = in_bin.astype(jnp.float32)
        prop = jnp.mean(in_bin_f)
        cnt = jnp.maximum(jnp.sum(in_bin_f), 1.0)
        acc_in = jnp.sum(acc * in_bin_f) / cnt
        conf_in = jnp.sum(conf * in_bin_f) / cnt
        ece = ece + jnp.where(prop > 0, jnp.abs(conf_in - acc_in) * prop, 0.0)
    return ece


if __name__ == "__main__":
    key = jax.random.PRNGKey(0)
    k_logits, k_labels = jax.random.split(key)

    # Small shape consistent with the module: 100 samples, 10-class logits.
    N, C, N_BINS = 100, 10, 15
    logits = jax.random.normal(k_logits, (N, C), dtype=jnp.float32) * 2.0
    labels = jax.random.randint(k_labels, (N,), 0, C, dtype=jnp.int32)

    out = ece_loss(logits, labels, n_bins=N_BINS)
    out = jax.block_until_ready(out)
    ref = ece_reference(logits, labels, n_bins=N_BINS)
    assert out.shape == (1,)
    assert jnp.allclose(out, ref, rtol=1e-5, atol=1e-6), (out, ref)

    # Larger run exercising multiple blocks + the parallel sample-split axis.
    N2 = 4096
    k2a, k2b = jax.random.split(jax.random.PRNGKey(1))
    logits2 = jax.random.normal(k2a, (N2, C), dtype=jnp.float32) * 2.0
    labels2 = jax.random.randint(k2b, (N2,), 0, C, dtype=jnp.int32)
    out2 = jax.block_until_ready(ece_loss(logits2, labels2, n_bins=N_BINS))
    ref2 = ece_reference(logits2, labels2, n_bins=N_BINS)
    assert jnp.allclose(out2, ref2, rtol=1e-4, atol=1e-5), (out2, ref2)

    print("KERNEL_OK")
</pallas_src>

<mosaic_0001>
module attributes {stable_mosaic.version = 11 : i64} {
  func.func @_ece_stats_kernel(%arg0: i32, %arg1: i32, %arg2: memref<112x10xf32, #tpu.memory_space<vmem>>, %arg3: memref<112x1xi32, #tpu.memory_space<vmem>>, %arg4: memref<1x3x15xf32, #tpu.memory_space<vmem>>) attributes {dimension_semantics = [#tpu.dimension_semantics<parallel>, #tpu.dimension_semantics<arbitrary>], iteration_bounds = array<i64: 1, 1>, scalar_prefetch = 0 : i64, scratch_operands = 0 : i64, tpu.core_type = #tpu.core_type<tc>, window_params = [{transform_indices = @transform_0, window_bounds = array<i64: 112, 10>}, {transform_indices = @transform_1, window_bounds = array<i64: 112, 1>}, {transform_indices = @transform_2, window_bounds = array<i64: 1, 3, 15>}]} {
    %c0_i32 = arith.constant 0 : i32
    %0 = arith.cmpi eq, %arg1, %c0_i32 : i32
    %1 = arith.extui %0 : i1 to i32
    %c0_i32_0 = arith.constant 0 : i32
    %2 = arith.cmpi ne, %1, %c0_i32_0 : i32
    scf.if %2 {
      %cst_21 = arith.constant 0.000000e+00 : f32
      %63 = vector.broadcast %cst_21 : f32 to vector<1x3x15xf32>
      %c0_22 = arith.constant 0 : index
      %c0_23 = arith.constant 0 : index
      %c0_24 = arith.constant 0 : index
      %64 = vector.load %arg4[%c0_22, %c0_23, %c0_24] : memref<1x3x15xf32, #tpu.memory_space<vmem>>, vector<1x3x15xf32>
      tpu.vector_store %arg4[%c0_22, %c0_23, %c0_24], %63 {strides = array<i32>} : memref<1x3x15xf32, #tpu.memory_space<vmem>>, vector<1x3x15xf32>,
    } else {
    }
    %c0 = arith.constant 0 : index
    %c0_1 = arith.constant 0 : index
    %3 = vector.load %arg2[%c0, %c0_1] : memref<112x10xf32, #tpu.memory_space<vmem>>, vector<112x10xf32>
    %c1_i32 = arith.constant 1 : i32
    %4 = arith.muli %arg0, %c1_i32 : i32
    %5 = arith.addi %4, %arg1 : i32
    %6 = tpu.iota {dimensions = array<i32: 0>} : vector<112x1xi32>
    %c112_i32 = arith.constant 112 : i32
    %7 = arith.muli %5, %c112_i32 : i32
    %8 = vector.broadcast %7 : i32 to vector<112x1xi32>
    %9 = arith.addi %6, %8 : vector<112x1xi32>
    %c100_i32 = arith.constant 100 : i32
    %10 = vector.broadcast %c100_i32 : i32 to vector<112x1xi32>
    %11 = arith.cmpi slt, %9, %10 : vector<112x1xi32>
    %cst = arith.constant dense<0xFF800000> : vector<112xf32>
    %12 = vector.multi_reduction <maximumf>, %3, %cst [1] : vector<112x10xf32> to vector<112xf32>
    %13 = vector.shape_cast %12 : vector<112xf32> to vector<112x1xf32>
    %14 = vector.broadcast %13 : vector<112x1xf32> to vector<112x10xf32>
    %15 = arith.subf %3, %14 : vector<112x10xf32>
    %16 = math.exp %15 : vector<112x10xf32>
    %cst_2 = arith.constant 1.000000e+00 : f32
    %17 = vector.broadcast %cst_2 : f32 to vector<10x1xf32>
    %cst_3 = arith.constant dense<0.000000e+00> : vector<112x1xf32>
    %18 = tpu.matmul %16, %17, %cst_3 {dimension_numbers = #tpu.dot_dimension_numbers<[1], [0], [0], [1], [0, 0, 1, 1], [], []>, precision = #tpu.contract_precision<fp32>} : vector<112x10xf32>, vector<10x1xf32>, vector<112x1xf32> -> vector<112x1xf32>
    %cst_4 = arith.constant 1.000000e+00 : f32
    %19 = vector.broadcast %cst_4 : f32 to vector<112x1xf32>
    %20 = arith.divf %19, %18 : vector<112x1xf32>
    %cst_5 = arith.constant 0.000000e+00 : f32
    %21 = vector.broadcast %cst_5 : f32 to vector<112x1xf32>
    %22 = arith.select %11, %20, %21 : vector<112x1xi1>, vector<112x1xf32>
    %23 = tpu.iota {dimensions = array<i32: 1>} : vector<112x10xi32>
    %24 = vector.broadcast %13 : vector<112x1xf32> to vector<112x10xf32>
    %25 = arith.cmpf oeq, %3, %24 : vector<112x10xf32>
    %c10_i32 = arith.constant 10 : i32
    %26 = vector.broadcast %c10_i32 : i32 to vector<112x10xi32>
    %27 = arith.select %25, %23, %26 : vector<112x10xi1>, vector<112x10xi32>
    %cst_6 = arith.constant dense<2147483647> : vector<112xi32>
    %28 = vector.multi_reduction <minsi>, %27, %cst_6 [1] : vector<112x10xi32> to vector<112xi32>
    %29 = vector.shape_cast %28 : vector<112xi32> to vector<112x1xi32>
    %c0_7 = arith.constant 0 : index
    %c0_8 = arith.constant 0 : index
    %30 = vector.load %arg3[%c0_7, %c0_8] : memref<112x1xi32, #tpu.memory_space<vmem>>, vector<112x1xi32>
    %31 = arith.cmpi eq, %29, %30 : vector<112x1xi32>
    %32 = arith.andi %11, %31 : vector<112x1xi1>
    %cst_9 = arith.constant 1.000000e+00 : f32
    %cst_10 = arith.constant 0.000000e+00 : f32
    %33 = vector.broadcast %cst_9 : f32 to vector<112x1xf32>
    %34 = vector.broadcast %cst_10 : f32 to vector<112x1xf32>
    %35 = arith.select %32, %33, %34 : vector<112x1xi1>, vector<112x1xf32>
    %36 = tpu.iota {dimensions = array<i32: 1>} : vector<1x15xi32>
    %37 = arith.sitofp %36 : vector<1x15xi32> to vector<1x15xf32>
    %cst_11 = arith.constant 1.500000e+01 : f32
    %38 = vector.broadcast %cst_11 : f32 to vector<1x15xf32>
    %39 = arith.divf %37, %38 : vector<1x15xf32>
    %cst_12 = arith.constant 1.000000e+00 : f32
    %40 = vector.broadcast %cst_12 : f32 to vector<1x15xf32>
    %41 = arith.addf %37, %40 : vector<1x15xf32>
    %cst_13 = arith.constant 1.500000e+01 : f32
    %42 = vector.broadcast %cst_13 : f32 to vector<1x15xf32>
    %43 = arith.divf %41, %42 : vector<1x15xf32>
    %44 = vector.broadcast %22 : vector<112x1xf32> to vector<112x15xf32>
    %45 = vector.broadcast %39 : vector<1x15xf32> to vector<112x15xf32>
    %46 = arith.cmpf ogt, %44, %45 : vector<112x15xf32>
    %47 = vector.broadcast %22 : vector<112x1xf32> to vector<112x15xf32>
    %48 = vector.broadcast %43 : vector<1x15xf32> to vector<112x15xf32>
    %49 = arith.cmpf ole, %47, %48 : vector<112x15xf32>
    %50 = arith.andi %46, %49 : vector<112x15xi1>
    %51 = vector.broadcast %11 : vector<112x1xi1> to vector<112x15xi1>
    %52 = arith.andi %50, %51 : vector<112x15xi1>
    %53 = arith.extui %52 : vector<112x15xi1> to vector<112x15xi32>
    %54 = arith.sitofp %53 : vector<112x15xi32> to vector<112x15xf32>
    %55 = arith.extui %11 : vector<112x1xi1> to vector<112x1xi32>
    %56 = arith.sitofp %55 : vector<112x1xi32> to vector<112x1xf32>
    %57 = tpu.concatenate %56, %22, %35 in 1 : vector<112x1xf32>, vector<112x1xf32>, vector<112x1xf32> -> vector<112x3xf32>
    %cst_14 = arith.constant dense<0.000000e+00> : vector<3x15xf32>
    %58 = tpu.matmul %57, %54, %cst_14 {dimension_numbers = #tpu.dot_dimension_numbers<[0], [0], [1], [1], [0, 1, 1, 1], [], []>, precision = #tpu.contract_precision<fp32>} : vector<112x3xf32>, vector<112x15xf32>, vector<3x15xf32> -> vector<3x15xf32>
    %c0_15 = arith.constant 0 : index
    %c0_16 = arith.constant 0 : index
    %c0_17 = arith.constant 0 : index
    %59 = vector.load %arg4[%c0_15, %c0_16, %c0_17] : memref<1x3x15xf32, #tpu.memory_space<vmem>>, vector<1x3x15xf32>
    %60 = vector.shape_cast %58 : vector<3x15xf32> to vector<1x3x15xf32>
    %61 = arith.addf %59, %60 : vector<1x3x15xf32>
    %c0_18 = arith.constant 0 : index
    %c0_19 = arith.constant 0 : index
    %c0_20 = arith.constant 0 : index
    %62 = vector.load %arg4[%c0_18, %c0_19, %c0_20] : memref<1x3x15xf32, #tpu.memory_space<vmem>>, vector<1x3x15xf32>
    tpu.vector_store %arg4[%c0_18, %c0_19, %c0_20], %61 {strides = array<i32>} : memref<1x3x15xf32, #tpu.memory_space<vmem>>, vector<1x3x15xf32>,
    return
  }
  func.func @transform_0(%arg0: i32, %arg1: i32) -> (i32, i32) {
    %c1_i32 = arith.constant 1 : i32
    %0 = arith.muli %arg0, %c1_i32 : i32
    %1 = arith.addi %0, %arg1 : i32
    %c0_i32 = arith.constant 0 : i32
    %2 = arith.minsi %1, %c0_i32 : i32
    %c0_i32_0 = arith.constant 0 : i32
    %c0_i32_1 = arith.constant 0 : i32
    return %2, %c0_i32_0 : i32, i32
  }
  func.func @transform_1(%arg0: i32, %arg1: i32) -> (i32, i32) {
    %c1_i32 = arith.constant 1 : i32
    %0 = arith.muli %arg0, %c1_i32 : i32
    %1 = arith.addi %0, %arg1 : i32
    %c0_i32 = arith.constant 0 : i32
    %2 = arith.minsi %1, %c0_i32 : i32
    %c0_i32_0 = arith.constant 0 : i32
    %c0_i32_1 = arith.constant 0 : i32
    return %2, %c0_i32_0 : i32, i32
  }
  func.func @transform_2(%arg0: i32, %arg1: i32) -> (i32, i32, i32) {
    %c0_i32 = arith.constant 0 : i32
    %c0_i32_0 = arith.constant 0 : i32
    %c0_i32_1 = arith.constant 0 : i32
    return %arg0, %c0_i32, %c0_i32_0 : i32, i32, i32
  }
}

</mosaic_0001>

<bundles_post_ra>
// kernel: tpu_custom_call.1
= control target key start
LH: loop header
LB: loop body
LE: loop exit
PB: predicated region body
PF: predicated region fallthrough
CT: control target
= control target key end

     0   :  { %vm161_vm0 = vcmask 80896   ;;  %vm288_vm1 = vcmask 1041408   ;;  %v3292_v28 = vmov 0   ;;  %v4700_v34 = vmov 0.0   ;;  %s3295_s18 = smov 2   ;;  %s3296_s29 = smov 1   ;;  %s4689_s0 = inlined_call_operand.vmem [shape: f32[100,10], index: 0, kind: input, shape index: {}]   ;;  %s4690_s1 = inlined_call_operand.vmem [shape: s32[100,1], index: 1, kind: input, shape index: {}]   ;;  %s4691_s2 = inlined_call_operand.vmem [shape: f32[1,3,15], index: 2, kind: output, shape index: {}]  }
   0x1   :  { %v3316_v0 = vld [vmem:[%s4689_s0 + $0x10] sm:$0xff]  ;;  %v3321_v1 = vld [vmem:[%s4689_s0] sm:$0xff]  ;;  %v3326_v2 = vld [vmem:[%s4689_s0 + $0x18] sm:$0xff]  ;;  %v290_v29 = vsel %vm288_vm1, 1.0, %v3292_v28  ;;  %3236 = vset.pattern.permute.xlu0 %v3292_v28  ;;  %3237 = vset.pattern.permute.xlu1 %v3292_v28  ;;  %v4693_v35 = vmov 1.0   ;;  %v4692_v36 = vlaneseq }
   0x2   :  { %v168_v3 = vsel %vm161_vm0, %v3316_v0, -inf  ;;  %v162_v4 = vsel %vm161_vm0, %v3321_v1, -inf  ;;  %v3335_v5 = vld [vmem:[%s4689_s0 + $0x8] sm:$0xff]  ;;  %v171_v6 = vsel %vm161_vm0, %v3326_v2, -inf  ;;  %v3349_v9 = vld [vmem:[%s4689_s0 + $0x20] sm:$0xff]  ;;  %v3358_v12 = vld [vmem:[%s4689_s0 + $0x38] sm:$0xff]  ;;  %v3412_v30 = vsub.f32 %v290_v29, %v290_v29  ;;  %2871 = vmatprep.subr.msk.mxu0 %vm288_vm1, %v4693_v35 }
   0x3   :  { %169 = vmax.xlane.f32.xlu1 %v168_v3  ;;  %163 = vmax.xlane.f32.xlu0 %v162_v4  ;;  %v165_v7 = vsel %vm161_vm0, %v3335_v5, -inf  ;;  %v3344_v8 = vld [vmem:[%s4689_s0 + $0x28] sm:$0xff]  ;;  %v174_v11 = vsel %vm161_vm0, %v3349_v9, -inf  ;;  %v3363_v13 = vld [vmem:[%s4689_s0 + $0x30] sm:$0xff]  ;;  %v183_v14 = vsel %vm161_vm0, %v3358_v12, -inf  ;;  %v3377_v17 = vld [vmem:[%s4689_s0 + $0x40] sm:$0xff] }
   0x4   :  { %v177_v10 = vsel %vm161_vm0, %v3344_v8, -inf  ;;  %v180_v15 = vsel %vm161_vm0, %v3363_v13, -inf  ;;  %v3372_v16 = vld [vmem:[%s4689_s0 + $0x48] sm:$0xff]  ;;  %v186_v19 = vsel %vm161_vm0, %v3377_v17, -inf  ;;  %v3386_v20 = vld [vmem:[%s4689_s0 + $0x50] sm:$0xff]  ;;  %v3391_v21 = vld [vmem:[%s4689_s0 + $0x58] sm:$0xff]  ;;  %2872 = vmatpush3.msk.msra.mxu0 %vm288_vm1, %v4693_v35 }
   0x5   :  { %v189_v18 = vsel %vm161_vm0, %v3372_v16, -inf  ;;  %v192_v22 = vsel %vm161_vm0, %v3386_v20, -inf  ;;  %v195_v23 = vsel %vm161_vm0, %v3391_v21, -inf  ;;  %v3400_v24 = vld [vmem:[%s4689_s0 + $0x60] sm:$0xff]  ;;  %v3405_v25 = vld [vmem:[%s4689_s0 + $0x68] sm:$0xff]  ;;  %v3415_v31 = vand.u32 4294901760, %v3412_v30  ;;  %2873 = vmatprep.subr.mxu0 %v4693_v35 }
   0x6   :  { %v198_v26 = vsel %vm161_vm0, %v3400_v24, -inf  ;;  %v201_v27 = vsel %vm161_vm0, %v3405_v25, -inf  ;;  %2874 = vmatpush3.msra.mxu0 %v4693_v35  ;;  %v3431_v37 = vand.u32 127, %v4692_v36 }
   0x7   :  { %172 = vmax.xlane.f32.xlu1 %v171_v6  ;;  %166 = vmax.xlane.f32.xlu0 %v165_v7  ;;  %v530_v32 = vsub.f32 %v3412_v30, %v3415_v31 }
   0x8   :  { %2921 = vmatprep.subr.mxu0 %v3412_v30  ;;  %4722 = vst [vmem:[#allocation2_spill] sm:$0xff] %v3431_v37 }
   0x9   :  { %v531_v33 = vand.u32 4294901760, %v530_v32 }
   0xb   :  { %178 = vmax.xlane.f32.xlu1 %v177_v10  ;;  %175 = vmax.xlane.f32.xlu0 %v174_v11 }
   0xc   :  { %2896 = vmatprep.subr.mxu1 %v531_v33 }
   0xd   :  { %2897 = vmatpush3.msra.mxu1 %v531_v33 }
   0xe   :  { %2898 = vmatprep.subr.mxu1 %v4700_v34 }
   0xf   :  { %184 = vmax.xlane.f32.xlu1 %v183_v14  ;;  %181 = vmax.xlane.f32.xlu0 %v180_v15 }
  0x10   :  { %2899 = vmatpush3.msra.mxu1 %v4700_v34 }
  0x11   :  { %2946 = vmatprep.subr.msk.mxu1 %vm288_vm1, %v4693_v35 }
  0x13   :  { %190 = vmax.xlane.f32.xlu1 %v189_v18  ;;  %187 = vmax.xlane.f32.xlu0 %v186_v19 }
  0x17   :  { %193 = vmax.xlane.f32.xlu0 %v192_v22  ;;  %196 = vmax.xlane.f32.xlu1 %v195_v23 }
  0x1b   :  { %199 = vmax.xlane.f32.xlu0 %v198_v26  ;;  %202 = vmax.xlane.f32.xlu1 %v201_v27 }
  0x8c   :  { %v170_v38 = vpop.xlane.xlu1 %169  ;;  %v164_v39 = vpop.xlane.xlu0 %163 }
  0x8d   :  { %v206_v40 = vsub.f32 %v3316_v0, %v170_v38  ;;  %vm1343_vm2 = vcmp.eq.f32.partialorder %v3316_v0, %v170_v38  ;;  %v204_v41 = vsub.f32 %v3321_v1, %v164_v39  ;;  %vm1341_vm3 = vcmp.eq.f32.partialorder %v3321_v1, %v164_v39 }
  0x8e   :  { %v1357_v42 = vsel %vm1343_vm2, %v3431_v37, 10  ;;  %v1355_v43 = vsel %vm1341_vm3, %v3431_v37, 10 }
  0x8f   :  { %v222_v44 = vmul.f32 1.442695, %v206_v40  ;;  %v218_v45 = vmul.f32 1.442695, %v204_v41  ;;  %v3440_v46 = vsel %vm161_vm0, %v1355_v43, 2147483647 }
  0x90   :  { %v173_v47 = vpop.xlane.xlu1 %172  ;;  %v167_v48 = vpop.xlane.xlu0 %166  ;;  %v1371_v49 = vshra.s32 %v3440_v46, 16  ;;  %v3444_v50 = vsel %vm161_vm0, %v1357_v42, 2147483647 }
  0x91   :  { %3238 = vpow2.f32 %v222_v44  ;;  %v207_v51 = vsub.f32 %v3326_v2, %v173_v47  ;;  %vm1344_vm4 = vcmp.eq.f32.partialorder %v3326_v2, %v173_v47  ;;  %v205_v52 = vsub.f32 %v3335_v5, %v167_v48 }
  0x92   :  { %3240 = vpow2.f32 %v218_v45  ;;  %v1358_v53 = vsel %vm1344_vm4, %v3431_v37, 10  ;;  %vm1342_vm5 = vcmp.eq.f32.partialorder %v3335_v5, %v167_v48  ;;  %v3451_v54 = vcvt.s32.f32 %v1371_v49 }
  0x93   :  { %v220_v55 = vmul.f32 1.442695, %v205_v52  ;;  %v1356_v56 = vsel %vm1342_vm5, %v3431_v37, 10  ;;  %v1401_v57 = vshra.s32 %v3444_v50, 16  ;;  %v224_v58 = vmul.f32 1.442695, %v207_v51 }
  0x94   :  { %v179_v59 = vpop.xlane.xlu1 %178  ;;  %1374 = vmin.xlane.f32.xlu0 %v3451_v54  ;;  %v176_v60 = vpop.xlane.xlu0 %175  ;;  %v3457_v61 = vsel %vm161_vm0, %v1356_v56, 2147483647  ;;  %v3463_v0 = vsel %vm161_vm0, %v1358_v53, 2147483647 }
  0x95   :  { %v209_v62 = vsub.f32 %v3344_v8, %v179_v59  ;;  %vm1346_vm6 = vcmp.eq.f32.partialorder %v3344_v8, %v179_v59  ;;  %v208_v63 = vsub.f32 %v3349_v9, %v176_v60  ;;  %3242 = vpow2.f32 %v220_v55 }
  0x96   :  { %v1360_v1 = vsel %vm1346_vm6, %v3431_v37, 10  ;;  %vm1345_vm7 = vcmp.eq.f32.partialorder %v3349_v9, %v176_v60  ;;  %v3467_v2 = vcvt.s32.f32 %v1401_v57  ;;  %v1386_v6 = vshra.s32 %v3457_v61, 16 }
  0x97   :  { %v228_v3 = vmul.f32 1.442695, %v209_v62  ;;  %v226_v4 = vmul.f32 1.442695, %v208_v63  ;;  %v1359_v5 = vsel %vm1345_vm7, %v3431_v37, 10  ;;  %3244 = vpow2.f32 %v224_v58 }
  0x98   :  { %v185_v7 = vpop.xlane.xlu1 %184  ;;  %1404 = vmin.xlane.f32.xlu0 %v3467_v2  ;;  %v182_v8 = vpop.xlane.xlu0 %181  ;;  %v1416_v10 = vshra.s32 %v3463_v0, 16  ;;  %v3474_v11 = vsel %vm161_vm0, %v1359_v5, 2147483647  ;;  %v3477_v9 = vsel %vm161_vm0, %v1360_v1, 2147483647  ;;  %v3481_v15 = vcvt.s32.f32 %v1386_v6 }
  0x99   :  { %3246 = vpow2.f32 %v228_v3  ;;  %v211_v14 = vsub.f32 %v3358_v12, %v185_v7  ;;  %vm1348_vm8 = vcmp.eq.f32.partialorder %v3358_v12, %v185_v7  ;;  %v210_v18 = vsub.f32 %v3363_v13, %v182_v8 }
  0x9a   :  { %3248 = vpow2.f32 %v226_v4  ;;  %vm1347_vm9 = vcmp.eq.f32.partialorder %v3363_v13, %v182_v8  ;;  %1389 = vmin.xlane.f32.xlu1 %v3481_v15  ;;  %v3487_v23 = vcvt.s32.f32 %v1416_v10  ;;  %v1431_v26 = vshra.s32 %v3474_v11, 16 }
  0x9b   :  { %v232_v19 = vmul.f32 1.442695, %v211_v14  ;;  %v1361_v22 = vsel %vm1347_vm9, %v3431_v37, 10  ;;  %v1362_v27 = vsel %vm1348_vm8, %v3431_v37, 10  ;;  %v230_v28 = vmul.f32 1.442695, %v210_v18 }
  0x9c   :  { %v191_v12 = vpop.xlane.xlu1 %190  ;;  %v188_v29 = vpop.xlane.xlu0 %187  ;;  %v1446_v32 = vshra.s32 %v3477_v9, 16  ;;  %v3493_v33 = vsel %vm161_vm0, %v1361_v22, 2147483647  ;;  %v3497_v38 = vcvt.s32.f32 %v1431_v26  ;;  %v3510_v52 = vsel %vm161_vm0, %v1362_v27, 2147483647 }
  0x9d   :  { %3250 = vpow2.f32 %v232_v19  ;;  %v213_v13 = vsub.f32 %v3372_v16, %v191_v12  ;;  %vm1350_vm10 = vcmp.eq.f32.partialorder %v3372_v16, %v191_v12  ;;  %v212_v41 = vsub.f32 %v3377_v17, %v188_v29 }
  0x9e   :  { %v3239_v39 = vpop.eup %3238  ;;  %3252 = vpow2.f32 %v230_v28  ;;  %v1364_v40 = vsel %vm1350_vm10, %v3431_v37, 10  ;;  %vm1349_vm11 = vcmp.eq.f32.partialorder %v3377_v17, %v188_v29  ;;  %1419 = vmin.xlane.f32.xlu1 %v3487_v23  ;;  %1434 = vmin.xlane.f32.xlu0 %v3497_v38  ;;  %v3505_v45 = vcvt.s32.f32 %v1446_v32 }
  0x9f   :  { %v3241_v42 = vpop.eup %3240  ;;  %v236_v43 = vmul.f32 1.442695, %v213_v13  ;;  %v1363_v44 = vsel %vm1349_vm11, %v3431_v37, 10  ;;  %v1461_v16 = vshra.s32 %v3493_v33, 16  ;;  %v234_v47 = vmul.f32 1.442695, %v212_v41 }
  0xa0   :  { %v194_v48 = vpop.xlane.xlu0 %193  ;;  %v247_v49 = vsel %vm161_vm0, %v3241_v42, 0  ;;  %v197_v51 = vpop.xlane.xlu1 %196  ;;  %v3513_v17 = vsel %vm161_vm0, %v3239_v39, 0  ;;  %v1476_v62 = vshra.s32 %v3510_v52, 16  ;;  %v3528_v63 = vsel %vm161_vm0, %v1363_v44, 2147483647 }
  0xa1   :  { %3254 = vpow2.f32 %v236_v43  ;;  %v3515_v53 = vcvt.s32.f32 %v1461_v16  ;;  %v214_v55 = vsub.f32 %v3386_v20, %v194_v48  ;;  %vm1351_vm12 = vcmp.eq.f32.partialorder %v3386_v20, %v194_v48  ;;  %4723 = vst [vmem:[#allocation3_spill] sm:$0xff] %v3528_v63 }
  0xa2   :  { %3256 = vpow2.f32 %v234_v47  ;;  %v1365_v56 = vsel %vm1351_vm12, %v3431_v37, 10  ;;  %v3520_v57 = vand.u32 4294901760, %v247_v49  ;;  %v215_v58 = vsub.f32 %v3391_v21, %v197_v51  ;;  %v3243_v59 = vpop.eup %3242  ;;  %1449 = vmin.xlane.f32.xlu1 %v3505_v45 }
  0xa3   :  { %1464 = vmin.xlane.f32.xlu0 %v3515_v53  ;;  %v238_v60 = vmul.f32 1.442695, %v214_v55  ;;  %vm1352_vm13 = vcmp.eq.f32.partialorder %v3391_v21, %v197_v51  ;;  %v1491_v3 = vshra.s32 %v3528_v63, 16  ;;  %v250_v5 = vsel %vm161_vm0, %v3243_v59, 0 }
  0xa4   :  { %2900 = vmatprep.mubr.f32.mxu1 %v3520_v57  ;;  %v240_v20 = vmul.f32 1.442695, %v215_v58  ;;  %v1366_v1 = vsel %vm1352_vm13, %v3431_v37, 10  ;;  %v200_v4 = vpop.xlane.xlu0 %199  ;;  %v203_v6 = vpop.xlane.xlu1 %202  ;;  %v3534_v8 = vcvt.s32.f32 %v1476_v62  ;;  %v3541_v19 = vand.u32 4294901760, %v250_v5 }
  0xa5   :  { %v3245_v7 = vpop.eup %3244  ;;  %3258 = vpow2.f32 %v238_v60  ;;  %v216_v21 = vsub.f32 %v3400_v24, %v200_v4  ;;  %vm1353_vm14 = vcmp.eq.f32.partialorder %v3400_v24, %v200_v4  ;;  %v3538_v14 = vcvt.s32.f32 %v1491_v3 }
  0xa6   :  { %4724 = vst [vmem:[#allocation4_spill] sm:$0xff] %v3534_v8  ;;  %v3247_v10 = vpop.eup %3246  ;;  %3260 = vpow2.f32 %v240_v20  ;;  %v1367_v18 = vsel %vm1353_vm14, %v3431_v37, 10  ;;  %1479 = vmin.xlane.f32.xlu1 %v3534_v8  ;;  %v3545_v27 = vand.u32 4294901760, %v3513_v17  ;;  %v217_v28 = vsub.f32 %v3405_v25, %v203_v6  ;;  %2901 = vmatmul.mubr.f32.vlgmr.msra.gmra.mxu1 %v3541_v19 }
  0xa7   :  { %4725 = vst [vmem:[#allocation5_spill] sm:$0xff] %v3538_v14  ;;  %v3249_v22 = vpop.eup %3248  ;;  %v242_v26 = vmul.f32 1.442695, %v216_v21  ;;  %v3549_v12 = vsel %vm161_vm0, %v1364_v40, 2147483647  ;;  %1494 = vmin.xlane.f32.xlu0 %v3538_v14  ;;  %v3558_v32 = vsub.f32 %v247_v49, %v3520_v57  ;;  %v256_v13 = vsel %vm161_vm0, %v3245_v7, 0  ;;  %2947 = vmatpush3.msk.msra.mxu1 %vm288_vm1, %v4693_v35 }
  0xa8   :  { %4726 = vst [vmem:[#allocation6_spill] sm:$0xff] %v3549_v12  ;;  %v1506_v24 = vshra.s32 %v3549_v12, 16  ;;  %v3555_v29 = vsel %vm161_vm0, %v1365_v56, 2147483647  ;;  %2903 = vmatprep.mubr.f32.mxu1 %v3545_v27  ;;  %v244_v25 = vmul.f32 1.442695, %v217_v28  ;;  %2948 = vmatprep.subr.mxu1 %v4693_v35  ;;  %v3589_v58 = vsub.f32 %v250_v5, %v3541_v19 }
  0xa9   :  { %4727 = vst [vmem:[#allocation7_spill] sm:$0xff] %v3555_v29  ;;  %3262 = vpow2.f32 %v242_v26  ;;  %v1521_v39 = vshra.s32 %v3555_v29, 16  ;;  %v3563_v40 = vand.u32 4294901760, %v256_v13  ;;  %v4697_v43 = vand.u32 4294901760, %v3558_v32  ;;  %2949 = vmatpush3.msra.mxu1 %v4693_v35 }
  0xaa   :  { %v3251_v41 = vpop.eup %3250  ;;  %v3567_v42 = vcvt.s32.f32 %v1506_v24  ;;  %v3571_v44 = vsel %vm161_vm0, %v1366_v1, 2147483647  ;;  %v3574_v16 = vsel %vm161_vm0, %v1367_v18, 2147483647  ;;  %3264 = vpow2.f32 %v244_v25  ;;  %2996 = vmatprep.subr.msk.mxu1 %vm288_vm1, %v4693_v35 }
  0xab   :  { %4729 = vst [vmem:[#allocation9_spill] sm:$0xff] %v3571_v44  ;;  %4730 = vst [vmem:[#allocation10_spill] sm:$0xff] %v3574_v16  ;;  %v3253_v47 = vpop.eup %3252  ;;  %v3577_v48 = vcvt.s32.f32 %v1521_v39  ;;  %v1536_v49 = vshra.s32 %v3571_v44, 16  ;;  %v1551_v51 = vshra.s32 %v3574_v16, 16  ;;  %v361_v55 = vsub.f32 %v3558_v32, %v4697_v43  ;;  %2904 = vmatmul.mubr.f32.gmra.mxu1 %v3563_v40 }
  0xac   :  { %4728 = vst [vmem:[#allocation8_spill] sm:$0xff] %v3567_v42  ;;  %1509 = vmin.xlane.f32.xlu1 %v3567_v42  ;;  %v259_v56 = vsel %vm161_vm0, %v3249_v22, 0  ;;  %v262_v59 = vsel %vm161_vm0, %v3247_v10, 0  ;;  %v4696_v5 = vand.u32 4294901760, %v3589_v58  ;;  %v3606_v6 = vsub.f32 %v3513_v17, %v3545_v27 }
  0xad   :  { %4731 = vst [vmem:[#allocation11_spill] sm:$0xff] %v3577_v48  ;;  %1524 = vmin.xlane.f32.xlu0 %v3577_v48  ;;  %v3593_v60 = vcvt.s32.f32 %v1536_v49  ;;  %v3595_v62 = vcvt.s32.f32 %v1551_v51  ;;  %v3597_v20 = vand.u32 4294901760, %v259_v56  ;;  %v3599_v1 = vand.u32 4294901760, %v262_v59 }
  0xae   :  { %v3255_v3 = vpop.eup %3254  ;;  %v362_v4 = vand.u32 4294901760, %v361_v55  ;;  %v265_v7 = vsel %vm161_vm0, %v3253_v47, 0  ;;  %v3613_v18 = vsub.f32 %v256_v13, %v3563_v40  ;;  %v268_v22 = vsel %vm161_vm0, %v3251_v41, 0 }
  0xaf   :  { %4732 = vst [vmem:[#allocation12_spill] sm:$0xff] %v3593_v60  ;;  %4733 = vst [vmem:[#allocation13_spill] sm:$0xff] %v3595_v62  ;;  %v3257_v21 = vpop.eup %3256  ;;  %2906 = vmatprep.mubr.f32.mxu1 %v3597_v20  ;;  %v3610_v10 = vand.u32 4294901760, %v265_v7  ;;  %v3617_v26 = vsub.f32 %v259_v56, %v3597_v20  ;;  %v371_v17 = vsub.f32 %v3589_v58, %v4696_v5  ;;  %v4695_v28 = vand.u32 4294901760, %v3606_v6 }
  0xb0   :  { %2875 = vmatprep.mubr.f32.mxu0 %v362_v4  ;;  %1539 = vmin.xlane.f32.xlu1 %v3593_v60  ;;  %v3624_v24 = vand.u32 4294901760, %v268_v22  ;;  %v271_v25 = vsel %vm161_vm0, %v3257_v21, 0  ;;  %v4698_v13 = vand.u32 4294901760, %v3613_v18  ;;  %v3634_v47 = vsub.f32 %v262_v59, %v3599_v1 }
  0xb1   :  { %1554 = vmin.xlane.f32.xlu0 %v3595_v62  ;;  %2907 = vmatmul.mubr.f32.gmra.mxu1 %v3599_v1  ;;  %v4699_v39 = vand.u32 4294901760, %v3617_v26  ;;  %v3631_v41 = vand.u32 4294901760, %v271_v25  ;;  %v372_v51 = vand.u32 4294901760, %v371_v17  ;;  %v381_v55 = vsub.f32 %v3606_v6, %v4695_v28 }
  0xb2   :  { %v3259_v49 = vpop.eup %3258  ;;  %2909 = vmatprep.mubr.f32.mxu1 %v3610_v10  ;;  %v274_v56 = vsel %vm161_vm0, %v3255_v3, 0  ;;  %v3642_v4 = vsub.f32 %v265_v7, %v3610_v10  ;;  %v391_v36 = vsub.f32 %v3613_v18, %v4698_v13  ;;  %v4702_v17 = vand.u32 4294901760, %v3634_v47 }
  0xb3   :  { %v3261_v21 = vpop.eup %3260  ;;  %v401_v59 = vsub.f32 %v3617_v26, %v4699_v39  ;;  %v3651_v35 = vand.u32 4294901760, %v274_v56  ;;  %2876 = vmatmul.mubr.f32.vlgmr.msra.gmra.mxu0 %v372_v51  ;;  %v382_v28 = vand.u32 4294901760, %v381_v55  ;;  %v277_v7 = vsel %vm161_vm0, %v3259_v49, 0 }
  0xb4   :  { %v4705_v3 = vand.u32 4294901760, %v3642_v4  ;;  %v3656_v5 = vsub.f32 %v268_v22, %v3624_v24  ;;  %v392_v43 = vand.u32 4294901760, %v391_v36  ;;  %v411_v39 = vsub.f32 %v3634_v47, %v4702_v17  ;;  %2922 = vmatpush3.msra.mxu0 %v3412_v30 }
  0xb5   :  { %2910 = vmatmul.mubr.f32.gmra.mxu1 %v3624_v24  ;;  %v402_v13 = vand.u32 4294901760, %v401_v59  ;;  %v3662_v34 = vand.u32 4294901760, %v277_v7  ;;  %2878 = vmatprep.mubr.f32.mxu0 %v382_v28  ;;  %v280_v49 = vsel %vm161_vm0, %v3261_v21, 0  ;;  %v3672_v55 = vsub.f32 %v271_v25, %v3631_v41 }
  0xb6   :  { %v3263_v51 = vpop.eup %3262  ;;  %2912 = vmatprep.mubr.f32.mxu1 %v3631_v41  ;;  %v421_v22 = vsub.f32 %v3642_v4, %v4705_v3  ;;  %v3674_v59 = vand.u32 4294901760, %v280_v49  ;;  %v3678_v30 = vsub.f32 %v274_v56, %v3651_v35  ;;  %v4734_v28 = vmov 0.0  }
  0xb7   :  { %v283_v17 = vsel %vm161_vm0, %v3263_v51, 0  ;;  %2923 = vmatprep.subr.mxu0 %v4734_v28  ;;  %v3265_v37 = vpop.eup %3264  ;;  %2879 = vmatmul.mubr.f32.gmra.mxu0 %v392_v43  ;;  %v412_v62 = vand.u32 4294901760, %v411_v39  ;;  %v440_v36 = vand.u32 4294901760, %v3672_v55  ;;  %v4735_v25 = vand.u32 4294901760, %v3656_v5 }
  0xb8   :  { %v422_v3 = vand.u32 4294901760, %v421_v22  ;;  %v3682_v60 = vand.u32 4294901760, %v283_v17  ;;  %2881 = vmatprep.mubr.f32.mxu0 %v402_v13  ;;  %v286_v56 = vsel %vm161_vm0, %v3265_v37, 0  ;;  %v3690_v51 = vsub.f32 %v277_v7, %v3662_v34  ;;  %2924 = vmatpush3.msra.mxu0 %v4734_v28 }
  0xb9   :  { %2913 = vmatmul.mubr.f32.gmra.mxu1 %v3651_v35  ;;  %v431_v21 = vsub.f32 %v3656_v5, %v4735_v25  ;;  %v3693_v43 = vsub.f32 %v280_v49, %v3674_v59  ;;  %v441_v39 = vsub.f32 %v3672_v55, %v440_v36  ;;  %v450_v13 = vand.u32 4294901760, %v3678_v30  ;;  %2971 = vmatprep.subr.mxu0 %v3415_v31 }
  0xba   :  { %2915 = vmatprep.mubr.f32.mxu1 %v3662_v34  ;;  %v3698_v22 = vand.u32 4294901760, %v286_v56  ;;  %v3701_v48 = vsub.f32 %v283_v17, %v3682_v60  ;;  %v460_v37 = vand.u32 4294901760, %v3690_v51  ;;  %v4736_v14 = vand.u32 4294901760, %v3558_v32 }
  0xbb   :  { %2882 = vmatmul.mubr.f32.gmra.mxu0 %v412_v62  ;;  %v470_v7 = vand.u32 4294901760, %v3693_v43  ;;  %v442_v25 = vand.u32 4294901760, %v441_v39  ;;  %v432_v42 = vand.u32 4294901760, %v431_v21  ;;  %v451_v44 = vsub.f32 %v3678_v30, %v450_v13 }
  0xbc   :  { %v3708_v49 = vsub.f32 %v286_v56, %v3698_v22  ;;  %2884 = vmatprep.mubr.f32.mxu0 %v422_v3  ;;  %v461_v16 = vsub.f32 %v3690_v51, %v460_v37  ;;  %v480_v17 = vand.u32 4294901760, %v3701_v48  ;;  %v4739_v63 = vmov 1.0  }
  0xbd   :  { %2916 = vmatmul.mubr.f32.gmra.mxu1 %v3674_v59  ;;  %v471_v62 = vsub.f32 %v3693_v43, %v470_v7  ;;  %v452_v39 = vand.u32 4294901760, %v451_v44 }
  0xbe   :  { %2918 = vmatprep.mubr.f32.mxu1 %v3682_v60  ;;  %v490_v29 = vand.u32 4294901760, %v3708_v49  ;;  %v462_v3 = vand.u32 4294901760, %v461_v16  ;;  %v481_v56 = vsub.f32 %v3701_v48, %v480_v17  ;;  %v4741_v16 = vand.u32 4294901760, %v3617_v26 }
  0xbf   :  { %2885 = vmatmul.mubr.f32.gmra.mxu0 %v432_v42  ;;  %v472_v21 = vand.u32 4294901760, %v471_v62  ;;  %v4737_v42 = vand.u32 4294901760, %v3589_v58  ;;  %v4742_v62 = vand.u32 4294901760, %v3634_v47 }
  0xc0   :  { %2887 = vmatprep.mubr.f32.mxu0 %v442_v25  ;;  %v491_v12 = vsub.f32 %v3708_v49, %v490_v29  ;;  %v482_v8 = vand.u32 4294901760, %v481_v56  ;;  %v4738_v25 = vand.u32 4294901760, %v3606_v6 }
  0xc1   :  { %2919 = vmatmul.mubr.f32.gmra.mxu1 %v3698_v22 }
  0xc2   :  { %2950 = vmatprep.mubr.f32.mxu1 %v4736_v14  ;;  %v492_v44 = vand.u32 4294901760, %v491_v12  ;;  %v4740_v14 = vand.u32 4294901760, %v3613_v18 }
  0xc3   :  { %2888 = vmatmul.mubr.f32.gmra.mxu0 %v452_v39 }
  0xc4   :  { %2890 = vmatprep.mubr.f32.mxu0 %v462_v3  ;;  %v4743_v3 = vand.u32 4294901760, %v3642_v4 }
  0xc5   :  { %2951 = vmatmul.mubr.f32.vlgmr.msra.gmra.mxu1 %v4737_v42 }
  0xc6   :  { %2953 = vmatprep.mubr.f32.mxu1 %v4738_v25  ;;  %2997 = vmatpush3.msk.msra.mxu1 %vm288_vm1, %v4739_v63 }
  0xc7   :  { %2998 = vmatprep.subr.mxu1 %v4739_v63  ;;  %2891 = vmatmul.mubr.f32.gmra.mxu0 %v472_v21  ;;  %v4754_v21 = vld [vmem:[#allocation11_spill] sm:$0xff] }
  0xc8   :  { %2999 = vmatpush3.msra.mxu1 %v4739_v63  ;;  %2893 = vmatprep.mubr.f32.mxu0 %v482_v8  ;;  %v4744_v8 = vand.u32 4294901760, %v3656_v5 }
  0xc9   :  { %2954 = vmatmul.mubr.f32.gmra.mxu1 %v4740_v14  ;;  %3050 = vmatprep.subr.mxu1 %v4734_v28 }
  0xca   :  { %2956 = vmatprep.mubr.f32.mxu1 %v4741_v16  ;;  %v4757_v16 = vld [vmem:[#allocation12_spill] sm:$0xff] }
  0xcb   :  { %2894 = vmatmul.mubr.f32.gmra.mxu0 %v492_v44 }
  0xcc   :  { %2925 = vmatprep.mubr.f32.mxu0 %v3558_v32 }
  0xcd   :  { %2957 = vmatmul.mubr.f32.gmra.mxu1 %v4742_v62 }
  0xce   :  { %2959 = vmatprep.mubr.f32.mxu1 %v4743_v3 }
  0xcf   :  { %2926 = vmatmul.mubr.f32.vlgmr.msra.gmra.mxu0 %v3589_v58 }
  0xd0   :  { %2928 = vmatprep.mubr.f32.mxu0 %v3606_v6  ;;  %2972 = vmatpush3.msra.mxu0 %v3415_v31  ;;  %v1370_v31 = vand.u32 65535, %v3440_v46 }
  0xd1   :  { %2960 = vmatmul.mubr.f32.gmra.mxu1 %v4744_v8  ;;  %2973 = vmatprep.subr.mxu0 %v4734_v28  ;;  %v4758_v8 = vld [vmem:[#allocation13_spill] sm:$0xff] }
  0xd2   :  { %2962 = vmatprep.mubr.f32.mxu1 %v440_v36  ;;  %2974 = vmatpush3.msra.mxu0 %v4734_v28 }
  0xd3   :  { %2929 = vmatmul.mubr.f32.gmra.mxu0 %v3613_v18  ;;  %3021 = vmatprep.subr.mxu0 %v4734_v28 }
  0xd4   :  { %2931 = vmatprep.mubr.f32.mxu0 %v3617_v26 }
  0xd5   :  { %2963 = vmatmul.mubr.f32.gmra.mxu1 %v450_v13  ;;  %v4750_v13 = vld [vmem:[#allocation9_spill] sm:$0xff] }
  0xd6   :  { %2965 = vmatprep.mubr.f32.mxu1 %v460_v37 }
  0xd7   :  { %2932 = vmatmul.mubr.f32.gmra.mxu0 %v3634_v47  ;;  %v4746_v47 = vld [vmem:[#allocation4_spill] sm:$0xff] }
  0xd8   :  { %2934 = vmatprep.mubr.f32.mxu0 %v3642_v4  ;;  %v4747_v4 = vld [vmem:[#allocation6_spill] sm:$0xff] }
  0xd9   :  { %2966 = vmatmul.mubr.f32.gmra.mxu1 %v470_v7  ;;  %v4752_v7 = vld [vmem:[#allocation8_spill] sm:$0xff] }
  0xda   :  { %2968 = vmatprep.mubr.f32.mxu1 %v480_v17  ;;  %v4753_v17 = vld [vmem:[#allocation10_spill] sm:$0xff] }
  0xdb   :  { %2935 = vmatmul.mubr.f32.gmra.mxu0 %v3656_v5  ;;  %v1550_v56 = vand.u32 65535, %v4753_v17 }
  0xdc   :  { %2937 = vmatprep.mubr.f32.mxu0 %v3672_v55  ;;  %v4749_v55 = vld [vmem:[#allocation7_spill] sm:$0xff] }
  0xdd   :  { %2969 = vmatmul.mubr.f32.gmra.mxu1 %v490_v29  ;;  %v1552_v62 = vcvt.s32.f32 %v1550_v56 }
  0xde   :  { %3000 = vmatprep.mubr.f32.mxu1 %v3520_v57 }
  0xdf   :  { %2938 = vmatmul.mubr.f32.gmra.mxu0 %v3678_v30 }
  0xe0   :  { %2940 = vmatprep.mubr.f32.mxu0 %v3690_v51 }
  0xe1   :  { %3001 = vmatmul.mubr.f32.vlgmr.msra.gmra.mxu1 %v3541_v19 }
  0xe2   :  { %3003 = vmatprep.mubr.f32.mxu1 %v3545_v27 }
  0xe3   :  { %2941 = vmatmul.mubr.f32.gmra.mxu0 %v3693_v43 }
  0xe4   :  { %2943 = vmatprep.mubr.f32.mxu0 %v3701_v48  ;;  %v1430_v48 = vand.u32 65535, %v3474_v11 }
  0xe5   :  { %3004 = vmatmul.mubr.f32.gmra.mxu1 %v3563_v40 }
  0xe6   :  { %3006 = vmatprep.mubr.f32.mxu1 %v3597_v20 }
  0xe7   :  { %2944 = vmatmul.mubr.f32.gmra.mxu0 %v3708_v49 }
  0xe8   :  { %2975 = vmatprep.mubr.f32.mxu0 %v3520_v57 }
  0xe9   :  { %3007 = vmatmul.mubr.f32.gmra.mxu1 %v3599_v1 }
  0xea   :  { %3009 = vmatprep.mubr.f32.mxu1 %v3610_v10 }
  0xeb   :  { %2976 = vmatmul.mubr.f32.vlgmr.msra.gmra.mxu0 %v3541_v19  ;;  %v1372_v19 = vcvt.s32.f32 %v1370_v31 }
  0xec   :  { %2978 = vmatprep.mubr.f32.mxu0 %v3545_v27  ;;  %v1400_v27 = vand.u32 65535, %v3444_v50  ;;  %v1415_v50 = vand.u32 65535, %v3463_v0 }
  0xed   :  { %3010 = vmatmul.mubr.f32.gmra.mxu1 %v3624_v24 }
  0xee   :  { %3012 = vmatprep.mubr.f32.mxu1 %v3631_v41  ;;  %v1402_v29 = vcvt.s32.f32 %v1400_v27 }
  0xef   :  { %2979 = vmatmul.mubr.f32.gmra.mxu0 %v3563_v40 }
  0xf0   :  { %2981 = vmatprep.mubr.f32.mxu0 %v3597_v20  ;;  %v1445_v20 = vand.u32 65535, %v3477_v9  ;;  %v1475_v9 = vand.u32 65535, %v3510_v52 }
  0xf1   :  { %3013 = vmatmul.mubr.f32.gmra.mxu1 %v3651_v35 }
  0xf2   :  { %3015 = vmatprep.mubr.f32.mxu1 %v3662_v34  ;;  %v1447_v6 = vcvt.s32.f32 %v1445_v20 }
  0xf3   :  { %2982 = vmatmul.mubr.f32.gmra.mxu0 %v3599_v1  ;;  %v1460_v1 = vand.u32 65535, %v3493_v33 }
  0xf4   :  { %2984 = vmatprep.mubr.f32.mxu0 %v3610_v10 }
  0xf5   :  { %3016 = vmatmul.mubr.f32.gmra.mxu1 %v3674_v59  ;;  %v1462_v10 = vcvt.s32.f32 %v1460_v1 }
  0xf6   :  { %3018 = vmatprep.mubr.f32.mxu1 %v3682_v60 }
  0xf7   :  { %2985 = vmatmul.mubr.f32.gmra.mxu0 %v3624_v24  ;;  %v1477_v24 = vcvt.s32.f32 %v1475_v9 }
  0xf8   :  { %2987 = vmatprep.mubr.f32.mxu0 %v3631_v41 }
  0xf9   :  { %3019 = vmatmul.mubr.f32.gmra.mxu1 %v3698_v22 }
  0xfb   :  { %2988 = vmatmul.mubr.f32.gmra.mxu0 %v3651_v35 }
  0xfc   :  { %2990 = vmatprep.mubr.f32.mxu0 %v3662_v34  ;;  %v1385_v34 = vand.u32 65535, %v3457_v61 }
  0xfe   :  { %v1387_v40 = vcvt.s32.f32 %v1385_v34 }
  0xff   :  { %2991 = vmatmul.mubr.f32.gmra.mxu0 %v3674_v59  ;;  %v1520_v59 = vand.u32 65535, %v4749_v55 }
 0x100   :  { %2993 = vmatprep.mubr.f32.mxu0 %v3682_v60  ;;  %v1417_v60 = vcvt.s32.f32 %v1415_v50 }
 0x101   :  { %v1522_v49 = vcvt.s32.f32 %v1520_v59 }
 0x103   :  { %2994 = vmatmul.mubr.f32.gmra.mxu0 %v3698_v22  ;;  %v1535_v22 = vand.u32 65535, %v4750_v13 }
 0x105   :  { %v1537_v44 = vcvt.s32.f32 %v1535_v22 }
 0x11d   :  { %v3788_v57 = vpop.xlane.xlu0 %1374 }
 0x11e   :  { %vm1376_vm15 = vcmp.eq.f32.partialorder %v3451_v54, %v3788_v57 }
 0x11f   :  { %v1377_v12 = vsel %vm1376_vm15, %v1372_v19, inf }
 0x120   :  { %1378 = vmin.xlane.f32.xlu1 %v1377_v12 }
 0x121   :  { %v3794_v35 = vpop.xlane.xlu0 %1404 }
 0x122   :  { %vm1406_vm0 = vcmp.eq.f32.partialorder %v3467_v2, %v3794_v35  ;;  %v1432_v2 = vcvt.s32.f32 %v1430_v48 }
 0x123   :  { %v1407_v32 = vsel %vm1406_vm0, %v1402_v29, inf  ;;  %v3798_v46 = vpop.xlane.xlu1 %1389 }
 0x124   :  { %1408 = vmin.xlane.f32.xlu1 %v1407_v32  ;;  %vm1391_vm1 = vcmp.eq.f32.partialorder %v3481_v15, %v3798_v46 }
 0x125   :  { %v1392_v54 = vsel %vm1391_vm1, %v1387_v40, inf }
 0x126   :  { %1393 = vmin.xlane.f32.xlu0 %v1392_v54 }
 0x127   :  { %v3804_v61 = vpop.xlane.xlu1 %1419  ;;  %v3806_v58 = vpop.xlane.xlu0 %1434 }
 0x128   :  { %vm1421_vm2 = vcmp.eq.f32.partialorder %v3487_v23, %v3804_v61  ;;  %vm1436_vm3 = vcmp.eq.f32.partialorder %v3497_v38, %v3806_v58  ;;  %v4745_v23 = vld [vmem:[#allocation3_spill] sm:$0xff] }
 0x129   :  { %v1422_v0 = vsel %vm1421_vm2, %v1417_v60, inf  ;;  %v1437_v11 = vsel %vm1436_vm3, %v1432_v2, inf  ;;  %v1490_v33 = vand.u32 65535, %v4745_v23 }
 0x12a   :  { %1423 = vmin.xlane.f32.xlu0 %v1422_v0  ;;  %1438 = vmin.xlane.f32.xlu1 %v1437_v11 }
 0x12b   :  { %v3814_v15 = vpop.xlane.xlu1 %1449  ;;  %v1492_v52 = vcvt.s32.f32 %v1490_v33 }
 0x12c   :  { %v3816_v5 = vpop.xlane.xlu0 %1464  ;;  %vm1451_vm4 = vcmp.eq.f32.partialorder %v3505_v45, %v3814_v15  ;;  %v1505_v45 = vand.u32 65535, %v4747_v4 }
 0x12d   :  { %vm1466_vm5 = vcmp.eq.f32.partialorder %v3515_v53, %v3816_v5  ;;  %v1452_v38 = vsel %vm1451_vm4, %v1447_v6, inf  ;;  %v4748_v53 = vld [vmem:[#allocation5_spill] sm:$0xff] }
 0x12e   :  { %v1467_v18 = vsel %vm1466_vm5, %v1462_v10, inf  ;;  %1453 = vmin.xlane.f32.xlu0 %v1452_v38  ;;  %v1507_v43 = vcvt.s32.f32 %v1505_v45 }
 0x12f   :  { %1468 = vmin.xlane.f32.xlu1 %v1467_v18  ;;  %v3824_v26 = vpop.xlane.xlu1 %1479 }
 0x130   :  { %v3826_v41 = vpop.xlane.xlu0 %1494  ;;  %vm1481_vm6 = vcmp.eq.f32.partialorder %v4746_v47, %v3824_v26 }
 0x131   :  { %v1482_v36 = vsel %vm1481_vm6, %v1477_v24, inf  ;;  %vm1496_vm7 = vcmp.eq.f32.partialorder %v4748_v53, %v3826_v41 }
 0x132   :  { %1483 = vmin.xlane.f32.xlu0 %v1482_v36  ;;  %v1497_v30 = vsel %vm1496_vm7, %v1492_v52, inf }
 0x133   :  { %1498 = vmin.xlane.f32.xlu1 %v1497_v30 }
 0x135   :  { %v3834_v51 = vpop.xlane.xlu1 %1509 }
 0x136   :  { %v3837_v37 = vpop.xlane.xlu0 %1524  ;;  %vm1511_vm8 = vcmp.eq.f32.partialorder %v4752_v7, %v3834_v51 }
 0x137   :  { %4751 = vst [vmem:[#allocation3_spill] sm:$0xff] %v3837_v37  ;;  %v1512_v39 = vsel %vm1511_vm8, %v1507_v43, inf  ;;  %vm1526_vm9 = vcmp.eq.f32.partialorder %v4754_v21, %v3837_v37  ;;  %v1411_v37 = vcvt.f32.s32 %v3794_v35  ;;  %v1516_v35 = vcvt.f32.s32 %v3834_v51 }
 0x138   :  { %1513 = vmin.xlane.f32.xlu0 %v1512_v39  ;;  %v1527_v42 = vsel %vm1526_vm9, %v1522_v49, inf }
 0x139   :  { %1528 = vmin.xlane.f32.xlu1 %v1527_v42  ;;  %v3844_v25 = vpop.xlane.xlu1 %1539 }
 0x13a   :  { %4755 = vst [vmem:[#allocation4_spill] sm:$0xff] %v3844_v25  ;;  %v3846_v14 = vpop.xlane.xlu0 %1554  ;;  %vm1541_vm10 = vcmp.eq.f32.partialorder %v4757_v16, %v3844_v25 }
 0x13b   :  { %4756 = vst [vmem:[#allocation6_spill] sm:$0xff] %v3846_v14  ;;  %v1542_v3 = vsel %vm1541_vm10, %v1537_v44, inf  ;;  %vm1556_vm11 = vcmp.eq.f32.partialorder %v4758_v8, %v3846_v14 }
 0x13c   :  { %1543 = vmin.xlane.f32.xlu0 %v1542_v3  ;;  %v1557_v31 = vsel %vm1556_vm11, %v1552_v62, inf  ;;  %vm1934_vm11 = vcmask 7168  }
 0x13d   :  { %1558 = vmin.xlane.f32.xlu1 %v1557_v31 }
 0x166   :  { %v2902_v19 = vpop.f32.mrf.mxu1 }
 0x168   :  { %v3852_v27 = vpop.f32.mrf.mxu1 }
 0x16b   :  { %v2905_v12 = vpop.f32.mrf.mxu1 }
 0x16d   :  { %v582_v34 = vpop.f32.mrf.mxu1 }
 0x171   :  { %v3854_v29 = vpop.f32.mrf.mxu1 }
 0x173   :  { %v3856_v32 = vpop.f32.mrf.mxu1  ;;  %v2877_v40 = vpop.f32.mrf.mxu0 }
 0x174   :  { %v3858_v50 = vadd.f32 %v2902_v19, %v2877_v40 }
 0x175   :  { %v2911_v48 = vpop.f32.mrf.mxu1  ;;  %v3860_v54 = vpop.f32.mrf.mxu0 }
 0x177   :  { %v606_v60 = vpop.f32.mrf.mxu1  ;;  %v2880_v2 = vpop.f32.mrf.mxu0 }
 0x178   :  { %v3862_v20 = vadd.f32 %v2905_v12, %v2880_v2 }
 0x179   :  { %v3864_v1 = vpop.f32.mrf.mxu1  ;;  %v384_v0 = vpop.f32.mrf.mxu0 }
 0x17a   :  { %v3866_v11 = vadd.f32 %v582_v34, %v384_v0 }
 0x17b   :  { %v3868_v6 = vpop.f32.mrf.mxu1  ;;  %v3870_v10 = vpop.f32.mrf.mxu0 }
 0x17d   :  { %v2917_v9 = vpop.f32.mrf.mxu1  ;;  %v3872_v23 = vpop.f32.mrf.mxu0 }
 0x17f   :  { %v630_v33 = vpop.f32.mrf.mxu1  ;;  %v2886_v38 = vpop.f32.mrf.mxu0 }
 0x180   :  { %v3874_v18 = vadd.f32 %v2911_v48, %v2886_v38 }
 0x181   :  { %v2920_v24 = vpop.f32.mrf.mxu1  ;;  %v424_v47 = vpop.f32.mrf.mxu0 }
 0x182   :  { %v3876_v52 = vadd.f32 %v606_v60, %v424_v47 }
 0x183   :  { %v3878_v4 = vpop.f32.mrf.mxu1  ;;  %v3880_v45 = vpop.f32.mrf.mxu0 }
 0x184   :  { %4759 = vst [vmem:[#allocation5_spill] sm:$0xff] %v3876_v52 }
 0x185   :  { %v3882_v36 = vpop.f32.mrf.mxu1  ;;  %v3884_v53 = vpop.f32.mrf.mxu0 }
 0x187   :  { %v3886_v55 = vpop.f32.mrf.mxu1  ;;  %v2892_v59 = vpop.f32.mrf.mxu0 }
 0x188   :  { %v3888_v30 = vadd.f32 %v2917_v9, %v2892_v59 }
 0x189   :  { %v3890_v43 = vpop.f32.mrf.mxu1  ;;  %v464_v13 = vpop.f32.mrf.mxu0 }
 0x18a   :  { %4760 = vst [vmem:[#allocation7_spill] sm:$0xff] %v3888_v30  ;;  %v3892_v22 = vadd.f32 %v630_v33, %v464_v13  ;;  %v1441_v30 = vcvt.f32.s32 %v3806_v58 }
 0x18b   :  { %v3894_v7 = vpop.f32.mrf.mxu1  ;;  %v2895_v49 = vpop.f32.mrf.mxu0 }
 0x18c   :  { %4761 = vst [vmem:[#allocation9_spill] sm:$0xff] %v3892_v22  ;;  %v1396_v22 = vcvt.f32.s32 %v3798_v46  ;;  %v1501_v46 = vcvt.f32.s32 %v3826_v41  ;;  %v1442_v52 = vshll.u32 %v1441_v30, 16  ;;  %v1579_v41 = vld [vmem:[%s4690_s1] sm:$0xff] }
 0x18d   :  { %v3896_v17 = vpop.f32.mrf.mxu1  ;;  %v3898_v56 = vpop.f32.mrf.mxu0 }
 0x18e   :  { %v1397_v58 = vshll.u32 %v1396_v22, 16  ;;  %v3980_v22 = vshll.u32 %v1516_v35, 16 }
 0x18f   :  { %v3900_v39 = vpop.f32.mrf.mxu1  ;;  %v2927_v21 = vpop.f32.mrf.mxu0 }
 0x191   :  { %v3902_v42 = vpop.f32.mrf.mxu1  ;;  %v722_v44 = vpop.f32.mrf.mxu0 }
 0x193   :  { %v3904_v16 = vpop.f32.mrf.mxu1  ;;  %v3906_v62 = vpop.f32.mrf.mxu0 }
 0x194   :  { %4762 = vst [vmem:[#allocation8_spill] sm:$0xff] %v3904_v16  ;;  %v1486_v16 = vcvt.f32.s32 %v3824_v26 }
 0x195   :  { %v3908_v3 = vpop.f32.mrf.mxu1  ;;  %v3910_v8 = vpop.f32.mrf.mxu0 }
 0x197   :  { %v3912_v31 = vpop.f32.mrf.mxu1  ;;  %v3914_v19 = vpop.f32.mrf.mxu0 }
 0x198   :  { %4763 = vst [vmem:[#allocation10_spill] sm:$0xff] %v3912_v31 }
 0x199   :  { %v3916_v12 = vpop.f32.mrf.mxu1  ;;  %v3918_v34 = vpop.f32.mrf.mxu0 }
 0x19a   :  { %4764 = vst [vmem:[#allocation11_spill] sm:$0xff] %v3916_v12 }
 0x19b   :  { %v3920_v40 = vpop.f32.mrf.mxu1  ;;  %v3922_v48 = vpop.f32.mrf.mxu0 }
 0x19c   :  { %4765 = vst [vmem:[#allocation12_spill] sm:$0xff] %v3920_v40 }
 0x19d   :  { %v2970_v60 = vpop.f32.mrf.mxu1  ;;  %v3924_v2 = vpop.f32.mrf.mxu0 }
 0x19e   :  { %4766 = vst [vmem:[#allocation13_spill] sm:$0xff] %v3924_v2  ;;  %v1381_v60 = vcvt.f32.s32 %v3788_v57 }
 0x19f   :  { %v3926_v0 = vpop.f32.mrf.mxu1  ;;  %v3928_v9 = vpop.f32.mrf.mxu0 }
 0x1a0   :  { %4767 = vst [vmem:[#allocation14_spill] sm:$0xff] %v3926_v0  ;;  %v1382_v57 = vshll.u32 %v1381_v60, 16 }
 0x1a1   :  { %v3930_v33 = vpop.f32.mrf.mxu1  ;;  %v3932_v38 = vpop.f32.mrf.mxu0 }
 0x1a3   :  { %v3934_v24 = vpop.f32.mrf.mxu1  ;;  %v3936_v47 = vpop.f32.mrf.mxu0 }
 0x1a4   :  { %4768 = vst [vmem:[#allocation15_spill] sm:$0xff] %v3936_v47  ;;  %v1426_v47 = vcvt.f32.s32 %v3804_v61 }
 0x1a5   :  { %v3938_v59 = vpop.f32.mrf.mxu1  ;;  %v3940_v13 = vpop.f32.mrf.mxu0 }
 0x1a6   :  { %4769 = vst [vmem:[#allocation16_spill] sm:$0xff] %v3940_v13  ;;  %v1456_v13 = vcvt.f32.s32 %v3814_v15  ;;  %v1427_v60 = vshll.u32 %v1426_v47, 16  ;;  %v595_v47 = vadd.f32 %v3856_v32, %v3872_v23  ;;  %v3999_v32 = vadd.f32 %v3878_v4, %v3898_v56 }
 0x1a7   :  { %v3942_v49 = vpop.f32.mrf.mxu1  ;;  %v2945_v63 = vpop.f32.mrf.mxu0  ;;  %v772_v56 = vadd.f32 %v3922_v48, %v3874_v18  ;;  %v1581_v18 = vld [vmem:[%s4690_s1 + $0x10] sm:$0xff] }
 0x1a8   :  { %4770 = vst [vmem:[#allocation17_spill] sm:$0xff] %v3942_v49  ;;  %v1471_v63 = vcvt.f32.s32 %v3816_v5  ;;  %v3964_v5 = vshll.u32 %v1456_v13, 16 }
 0x1a9   :  { %v3945_v40 = vpop.f32.mrf.mxu1  ;;  %v1379_v12 = vpop.xlane.xlu1 %1378 }
 0x1aa   :  { %v3949_v14 = vpop.f32.mrf.mxu0  ;;  %v1380_v25 = vcvt.f32.s32 %v1379_v12  ;;  %v571_v12 = vadd.f32 %v3852_v27, %v3860_v54  ;;  %v3973_v27 = vshll.u32 %v1486_v16, 16  ;;  %v3975_v54 = vshll.u32 %v1501_v46, 16 }
 0x1ab   :  { %4771 = vst [vmem:[#allocation18_spill] sm:$0xff] %v3949_v14  ;;  %v3954_v0 = vpop.f32.mrf.mxu1  ;;  %v1412_v14 = vshll.u32 %v1411_v37, 16  ;;  %v730_v37 = vadd.f32 %v2927_v21, %v3858_v50  ;;  %v625_v16 = vadd.f32 %v3864_v1, %v3880_v45  ;;  %v619_v50 = vadd.f32 %v3868_v6, %v3884_v53 }
 0x1ac   :  { %4772 = vst [vmem:[#allocation19_spill] sm:$0xff] %v3954_v0  ;;  %v2977_v49 = vpop.f32.mrf.mxu0  ;;  %v1383_v31 = vadd.s32 %v1382_v57, %v1380_v25  ;;  %v723_v26 = vadd.f32 %v722_v44, %v571_v12  ;;  %v3971_v0 = vshll.u32 %v1471_v63, 16  ;;  %v601_v44 = vadd.f32 %v3854_v29, %v3870_v10  ;;  %v1580_v29 = vld [vmem:[%s4690_s1 + $0x8] sm:$0xff] }
 0x1ad   :  { %v3962_v61 = vpop.f32.mrf.mxu1  ;;  %v1409_v2 = vpop.xlane.xlu1 %1408  ;;  %v744_v6 = vadd.f32 %v3906_v62, %v3862_v20  ;;  %v737_v53 = vadd.f32 %v3910_v8, %v3866_v11  ;;  %v896_v46 = vadd.f32 %v3882_v36, %v730_v37  ;;  %v786_v36 = vadd.f32 %v3928_v9, %v625_v16  ;;  %v1583_v16 = vld [vmem:[%s4690_s1 + $0x20] sm:$0xff] }
 0x1ae   :  { %v1065_v15 = vpop.f32.mrf.mxu0  ;;  %vm1593_vm12 = vcmp.eq.s32.totalorder %v1383_v31, %v1579_v41  ;;  %v1410_v63 = vcvt.f32.s32 %v1409_v2  ;;  %v758_v10 = vadd.f32 %v3914_v19, %v601_v44  ;;  %v888_v23 = vadd.f32 %v3886_v55, %v723_v26  ;;  %v1582_v31 = vld [vmem:[%s4690_s1 + $0x18] sm:$0xff] }
 0x1af   :  { %v3969_v51 = vpop.f32.mrf.mxu1  ;;  %v1394_v30 = vpop.xlane.xlu0 %1393  ;;  %v751_v2 = vadd.f32 %v3918_v34, %v595_v47  ;;  %v1621_v20 = vsel %vm1593_vm12, 1.0, %v4734_v28  ;;  %v1072_v26 = vadd.f32 %v2977_v49, %v896_v46  ;;  %v912_v41 = vadd.f32 %v3890_v43, %v744_v6 }
 0x1b0   :  { %v3978_v25 = vpop.f32.mrf.mxu0  ;;  %v1395_v13 = vcvt.f32.s32 %v1394_v30  ;;  %v1066_v19 = vadd.f32 %v1065_v15, %v888_v23  ;;  %v1413_v62 = vadd.s32 %v1412_v14, %v1410_v63  ;;  %v928_v48 = vadd.f32 %v3896_v17, %v758_v10  ;;  %v1584_v23 = vld [vmem:[%s4690_s1 + $0x28] sm:$0xff] }
 0x1b1   :  { %v3986_v57 = vpop.f32.mrf.mxu1  ;;  %v904_v37 = vadd.f32 %v3894_v7, %v737_v53  ;;  %v920_v17 = vadd.f32 %v3900_v39, %v751_v2  ;;  %v1222_v39 = vadd.f32 %v3930_v33, %v1072_v26  ;;  %v4774_v26 = vld [vmem:[#allocation5_spill] sm:$0xff]  ;;  %vm1949_vm12 = vcmask 15360  }
 0x1b2   :  { %v3992_v21 = vpop.f32.mrf.mxu0  ;;  %v1398_v1 = vadd.s32 %v1397_v58, %v1395_v13  ;;  %v1216_v47 = vadd.f32 %v3934_v24, %v1066_v19  ;;  %vm1595_vm14 = vcmp.eq.s32.totalorder %v1413_v62, %v1581_v18  ;;  %v779_v24 = vadd.f32 %v3932_v38, %v619_v50  ;;  %v4775_v18 = vld [vmem:[#allocation13_spill] sm:$0xff] }
 0x1b3   :  { %v4003_v45 = vpop.f32.mrf.mxu1  ;;  %v1439_v4 = vpop.xlane.xlu1 %1438  ;;  %v1623_v46 = vsel %vm1595_vm14, 1.0, %v4734_v28  ;;  %v4773_v62 = vld [vmem:[#allocation19_spill] sm:$0xff] }
 0x1b4   :  { %v2983_v35 = vpop.f32.mrf.mxu0  ;;  %vm1594_vm13 = vcmp.eq.s32.totalorder %v1398_v1, %v1580_v29  ;;  %v1424_v55 = vpop.xlane.xlu0 %1423  ;;  %v1440_v11 = vcvt.f32.s32 %v1439_v4  ;;  %v960_v1 = vadd.f32 %v3908_v3, %v786_v36  ;;  %3266 = vrcp.f32 %v1216_v47  ;;  %v1585_v3 = vld [vmem:[%s4690_s1 + $0x30] sm:$0xff] }
 0x1b5   :  { %v4013_v12 = vpop.f32.mrf.mxu1  ;;  %v1425_v8 = vcvt.f32.s32 %v1424_v55  ;;  %v1622_v34 = vsel %vm1594_vm13, 1.0, %v4734_v28  ;;  %v1096_v13 = vadd.f32 %v2983_v35, %v928_v48  ;;  %3268 = vrcp.f32 %v1222_v39  ;;  %v4780_v39 = vld [vmem:[#allocation14_spill] sm:$0xff] }
 0x1b6   :  { %v1089_v58 = vpop.f32.mrf.mxu0  ;;  %v3201_v14 = vpack.i.bf16 %v1622_v34, %v1621_v20  ;;  %v1443_v30 = vadd.s32 %v1442_v52, %v1440_v11  ;;  %v944_v52 = vadd.f32 %v3902_v42, %v772_v56  ;;  %v765_v48 = vadd.f32 %v4775_v18, %v4774_v26 }
 0x1b7   :  { %v4026_v15 = vpop.f32.mrf.mxu1  ;;  %v1428_v9 = vadd.s32 %v1427_v60, %v1425_v8  ;;  %v1084_v60 = vadd.f32 %v3978_v25, %v912_v41  ;;  %v1090_v6 = vadd.f32 %v1089_v58, %v920_v17  ;;  %v1246_v38 = vadd.f32 %v3945_v40, %v1096_v13  ;;  %v1588_v13 = vld [vmem:[%s4690_s1 + $0x48] sm:$0xff] }
 0x1b8   :  { %v4030_v49 = vpop.f32.mrf.mxu0  ;;  %v1469_v44 = vpop.xlane.xlu1 %1468  ;;  %3202 = vrot.lane.b32.xlu1 %v3201_v14, %s3295_s18  ;;  %vm1597_vm0 = vcmp.eq.s32.totalorder %v1443_v30, %v1583_v16  ;;  %v1078_v40 = vadd.f32 %v3992_v21, %v904_v37  ;;  %v4777_v30 = vld [vmem:[#allocation18_spill] sm:$0xff]  ;;  %vm4720_vm13 = vmmov 0  }
 0x1b9   :  { %v1470_v63 = vcvt.f32.s32 %v1469_v44  ;;  %v1454_v29 = vpop.xlane.xlu0 %1453  ;;  %v3020_v10 = vpop.f32.mrf.mxu1  ;;  %vm1596_vm15 = vcmp.eq.s32.totalorder %v1428_v9, %v1582_v31  ;;  %v1234_v19 = vadd.f32 %v3938_v59, %v1084_v60  ;;  %v1625_v55 = vsel %vm1597_vm0, 1.0, %v4734_v28  ;;  %v4776_v31 = vld [vmem:[#allocation10_spill] sm:$0xff]  ;;  %3076 = vmatprep.mubr.msk.f32.mxu1 %vm4720_vm13, %v4734_v28  ;;  %3047 = vmatprep.mubr.msk.f32.mxu0 %vm4720_vm13, %v4734_v28 }
 0x1ba   :  { %v4039_v43 = vpop.f32.mrf.mxu0  ;;  %v1455_v7 = vcvt.f32.s32 %v1454_v29  ;;  %v1624_v2 = vsel %vm1596_vm15, 1.0, %v4734_v28  ;;  %v1240_v58 = vadd.f32 %v4773_v62, %v1090_v6  ;;  %3270 = vrcp.f32 %v1246_v38  ;;  %v4787_v62 = vld [vmem:[#allocation16_spill] sm:$0xff] }
 0x1bb   :  { %v1473_v33 = vadd.s32 %v3971_v0, %v1470_v63  ;;  %v3206_v56 = vpack.i.bf16 %v1624_v2, %v1623_v46  ;;  %v1586_v0 = vld [vmem:[%s4690_s1 + $0x38] sm:$0xff]  ;;  %v952_v14 = vadd.f32 %v4776_v31, %v779_v24  ;;  %v807_v9 = vadd.f32 %v4777_v30, %v3999_v32  ;;  %v4790_v30 = vld [vmem:[#allocation12_spill] sm:$0xff] }
 0x1bc   :  { %v1458_v53 = vadd.s32 %v3964_v5, %v1455_v7  ;;  %v2989_v42 = vpop.f32.mrf.mxu0  ;;  %v1499_v50 = vpop.xlane.xlu1 %1498  ;;  %3272 = vrcp.f32 %v1234_v19  ;;  %v1108_v47 = vadd.f32 %v4030_v49, %v944_v52  ;;  %v4779_v49 = vld [vmem:[#allocation8_spill] sm:$0xff] }
 0x1bd   :  { %v1484_v25 = vpop.xlane.xlu0 %1483  ;;  %v1500_v5 = vcvt.f32.s32 %v1499_v50  ;;  %3207 = vrot.lane.b32.xlu0 %v3206_v56, %s3295_s18  ;;  %vm1599_vm2 = vcmp.eq.s32.totalorder %v1473_v33, %v1585_v3  ;;  %v1120_v21 = vadd.f32 %v2989_v42, %v960_v1  ;;  %3274 = vrcp.f32 %v1240_v58  ;;  %v4781_v33 = vld [vmem:[#allocation7_spill] sm:$0xff]  ;;  %v4784_v56 = vld [vmem:[#allocation6_spill] sm:$0xff] }
 0x1be   :  { %vm1598_vm1 = vcmp.eq.s32.totalorder %v1458_v53, %v1584_v23  ;;  %v1113_v35 = vpop.f32.mrf.mxu0  ;;  %v1485_v4 = vcvt.f32.s32 %v1484_v25  ;;  %v1627_v63 = vsel %vm1599_vm2, 1.0, %v4734_v28  ;;  %v936_v52 = vadd.f32 %v4779_v49, %v765_v48  ;;  %v4782_v50 = vld [vmem:[#allocation15_spill] sm:$0xff] }
 0x1bf   :  { %v1626_v20 = vsel %vm1598_vm1, 1.0, %v4734_v28  ;;  %v1503_v34 = vadd.s32 %v3975_v54, %v1500_v5  ;;  %v4778_v54 = vld [vmem:[#allocation17_spill] sm:$0xff]  ;;  %v1270_v32 = vadd.f32 %v3986_v57, %v1120_v21  ;;  %v1114_v10 = vadd.f32 %v1113_v35, %v952_v14  ;;  %v1287_v35 = vpop.f32.mrf.mxu1 }
 0x1c0   :  { %v1488_v11 = vadd.s32 %v3973_v27, %v1485_v4  ;;  %v4067_v8 = vpop.f32.mrf.mxu0  ;;  %v3211_v59 = vpack.i.bf16 %v1626_v20, %v1625_v55  ;;  %v1587_v27 = vld [vmem:[%s4690_s1 + $0x40] sm:$0xff]  ;;  %v1228_v44 = vadd.f32 %v4778_v54, %v1078_v40  ;;  %v984_v60 = vadd.f32 %v4780_v39, %v807_v9  ;;  %v4786_v20 = vld [vmem:[#allocation9_spill] sm:$0xff] }
 0x1c1   :  { %v1514_v36 = vpop.xlane.xlu0 %1513  ;;  %vm1601_vm4 = vcmp.eq.s32.totalorder %v1503_v34, %v1587_v27  ;;  %v1102_v57 = vadd.f32 %v4039_v43, %v936_v52  ;;  %v1264_v53 = vadd.f32 %v4003_v45, %v1114_v10  ;;  %v4100_v2 = vpop.eup %3266  ;;  %v800_v25 = vadd.f32 %v4782_v50, %v4781_v33  ;;  %v4783_v43 = vld [vmem:[#allocation4_spill] sm:$0xff] }
 0x1c2   :  { %vm1600_vm3 = vcmp.eq.s32.totalorder %v1488_v11, %v1586_v0  ;;  %v4077_v41 = vpop.f32.mrf.mxu0  ;;  %v1515_v37 = vcvt.f32.s32 %v1514_v36  ;;  %3212 = vrot.lane.b32.xlu1 %v3211_v59, %s3295_s18  ;;  %v1529_v24 = vpop.xlane.xlu1 %1528  ;;  %3276 = vrcp.f32 %v1228_v44  ;;  %v1629_v1 = vsel %vm1601_vm4, 1.0, %v4734_v28  ;;  %v4785_v0 = vld [vmem:[#allocation3_spill] sm:$0xff]  ;;  %v1589_v10 = vld [vmem:[%s4690_s1 + $0x50] sm:$0xff] }
 0x1c3   :  { %v1628_v29 = vsel %vm1600_vm3, 1.0, %v4734_v28  ;;  %3278 = vrcp.f32 %v1270_v32  ;;  %v4107_v46 = vpop.eup %3268  ;;  %v1546_v3 = vcvt.f32.s32 %v4783_v43  ;;  %v1252_v45 = vadd.f32 %v3969_v51, %v1102_v57  ;;  %v4788_v11 = vld [vmem:[#allocation11_spill] sm:$0xff] }
 0x1c4   :  { %v1518_v17 = vadd.s32 %v3980_v22, %v1515_v37  ;;  %v2995_v16 = vpop.f32.mrf.mxu0  ;;  %v3216_v7 = vpack.i.bf16 %v1628_v29, %v1627_v63  ;;  %v1258_v22 = vadd.f32 %v3962_v61, %v1108_v47  ;;  %v1561_v19 = vcvt.f32.s32 %v4784_v56  ;;  %v1591_v29 = vld [vmem:[%s4690_s1 + $0x60] sm:$0xff] }
 0x1c5   :  { %v1544_v61 = vpop.xlane.xlu0 %1543  ;;  %v1531_v55 = vcvt.f32.s32 %v4785_v0  ;;  %v793_v58 = vadd.f32 %v4787_v62, %v4786_v20  ;;  %v976_v59 = vadd.f32 %v4788_v11, %v800_v25  ;;  %v4789_v34 = vlaneseq }
 0x1c6   :  { %vm1602_vm5 = vcmp.eq.s32.totalorder %v1518_v17, %v1588_v13  ;;  %v1137_v23 = vpop.f32.mrf.mxu0  ;;  %3217 = vrot.lane.b32.xlu0 %v3216_v7, %s3295_s18  ;;  %3280 = vrcp.f32 %v1258_v22  ;;  %v1559_v5 = vpop.xlane.xlu1 %1558  ;;  %v1545_v21 = vcvt.f32.s32 %v1544_v61  ;;  %v1547_v48 = vshll.u32 %v1546_v3, 16  ;;  %v1590_v13 = vld [vmem:[%s4690_s1 + $0x58] sm:$0xff] }
 0x1c7   :  { %v1630_v6 = vsel %vm1602_vm5, 1.0, %v4734_v28  ;;  %v1138_v38 = vadd.f32 %v1137_v23, %v984_v60  ;;  %3282 = vrcp.f32 %v1264_v53  ;;  %v4111_v4 = vpop.eup %3270  ;;  %v117_v36 = vshrl.u32 %v4789_v34, 7 }
 0x1c8   :  { %v3221_v42 = vpack.i.bf16 %v1630_v6, %v1629_v1  ;;  %v1560_v26 = vcvt.f32.s32 %v1559_v5  ;;  %3284 = vrcp.f32 %v1252_v45  ;;  %v1132_v31 = vadd.f32 %v4067_v8, %v976_v59 }
 0x1c9   :  { %v1288_v40 = vadd.f32 %v1287_v35, %v1138_v38  ;;  %v4122_v51 = vpop.eup %3272  ;;  %v1530_v14 = vcvt.f32.s32 %v1529_v24  ;;  %v1562_v27 = vshll.u32 %v1561_v19, 16  ;;  %v1532_v37 = vshll.u32 %v1531_v55, 16 }
 0x1ca   :  { %1836 = vrot.lane.b32.xlu0 %v4100_v2, %s3296_s29  ;;  %3222 = vrot.lane.b32.xlu1 %v3221_v42, %s3295_s18  ;;  %v3275_v18 = vpop.eup %3274  ;;  %v968_v9 = vadd.f32 %v4790_v30, %v793_v58  ;;  %v1548_v54 = vadd.s32 %v1547_v48, %v1545_v21  ;;  %v4130_v44 = vadd.s32 96, %v117_v36  ;;  %v1282_v17 = vadd.f32 %v4013_v12, %v1132_v31 }
 0x1cb   :  { %3286 = vrcp.f32 %v1288_v40  ;;  %v1563_v47 = vadd.s32 %v1562_v27, %v1560_v26  ;;  %v1533_v63 = vadd.s32 %v1532_v37, %v1530_v14 }
 0x1cc   :  { %v1126_v16 = vadd.f32 %v4077_v41, %v968_v9  ;;  %vm1604_vm6 = vcmp.eq.s32.totalorder %v1548_v54, %v1590_v13  ;;  %vm159_vm7 = vcmp.lt.s32.totalorder %v4130_v44, 100  ;;  %3288 = vrcp.f32 %v1282_v17 }
 0x1cd   :  { %vm1605_vm8 = vcmp.eq.s32.totalorder %v1563_v47, %v1591_v29  ;;  %vm1603_vm9 = vcmp.eq.s32.totalorder %v1533_v63, %v1589_v10  ;;  %v1632_v49 = vsel %vm1604_vm6, 1.0, %v4734_v28 }
 0x1ce   :  { %1846 = vrot.lane.b32.xlu0 %v4111_v4, %s3296_s29  ;;  %1838 = vrot.lane.b32.xlu1 %v4107_v46, %s3296_s29  ;;  %v1276_v41 = vadd.f32 %v4026_v15, %v1126_v16  ;;  %vm1619_vm10 = vmand %vm159_vm7, %vm1605_vm8  ;;  %v1631_v52 = vsel %vm1603_vm9, 1.0, %v4734_v28 }
 0x1cf   :  { %v3277_v8 = vpop.eup %3276  ;;  %v3226_v24 = vpack.i.bf16 %v1632_v49, %v1631_v52  ;;  %v1633_v60 = vsel %vm1619_vm10, 1.0, %v4734_v28 }
 0x1d0   :  { %v3279_v32 = vpop.eup %3278  ;;  %3290 = vrcp.f32 %v1276_v41  ;;  %v3231_v15 = vpack.i.bf16 %v4734_v28, %v1633_v60 }
 0x1d2   :  { %1844 = vrot.lane.b32.xlu0 %v3275_v18, %s3296_s29  ;;  %1842 = vrot.lane.b32.xlu1 %v4122_v51, %s3296_s29 }
 0x1d3   :  { %v3281_v12 = vpop.eup %3280 }
 0x1d4   :  { %v3283_v7 = vpop.eup %3282 }
 0x1d5   :  { %v3285_v39 = vpop.eup %3284 }
 0x1d6   :  { %1854 = vrot.lane.b32.xlu0 %v3279_v32, %s3296_s29  ;;  %1840 = vrot.lane.b32.xlu1 %v3277_v8, %s3296_s29 }
 0x1d8   :  { %v3287_v23 = vpop.eup %3286 }
 0x1d9   :  { %v1337_v22 = vsel %vm159_vm7, %v3287_v23, 0.0  ;;  %v3289_v1 = vpop.eup %3288  ;;  %v2651_v23 = vsel %vm159_vm7, 1.0, %v4734_v28 }
 0x1da   :  { %1852 = vrot.lane.b32.xlu0 %v3283_v7, %s3296_s29  ;;  %1850 = vrot.lane.b32.xlu1 %v3281_v12, %s3296_s29 }
 0x1dd   :  { %v3291_v6 = vpop.eup %3290 }
 0x1de   :  { %1848 = vrot.lane.b32.xlu1 %v3285_v39, %s3296_s29  ;;  %3227 = vrot.lane.b32.xlu0 %v3226_v24, %s3295_s18 }
 0x1e2   :  { %3232 = vrot.lane.b32.xlu1 %v3231_v15, %s3295_s18  ;;  %1860 = vrot.lane.b32.xlu0 %v1337_v22, %s3296_s29  ;;  %v4791_v15 = vld [vmem:[#allocation2_spill] sm:$0xff] }
 0x1e6   :  { %1858 = vrot.lane.b32.xlu1 %v3289_v1, %s3296_s29  ;;  %1862 = vrot.lane.b32.xlu0 %v4734_v28, %s3296_s29 }
 0x1ea   :  { %1856 = vrot.lane.b32.xlu1 %v3291_v6, %s3296_s29  ;;  %1697 = vperm.xlu0 %3236, %v3289_v1  }
 0x1ee   :  { %1692 = vperm.xlu1 %3237, %v3291_v6   ;;  %1682 = vperm.xlu0 %3236, %v3283_v7  }
 0x1f2   :  { %1687 = vperm.xlu1 %3237, %v3279_v32   ;;  %1672 = vperm.xlu0 %3236, %v3285_v39  }
 0x1f6   :  { %1677 = vperm.xlu1 %3237, %v3281_v12   ;;  %1662 = vperm.xlu0 %3236, %v3275_v18  }
 0x1fa   :  { %1667 = vperm.xlu1 %3237, %v4111_v4   ;;  %1652 = vperm.xlu0 %3236, %v3277_v8  }
 0x1fe   :  { %1657 = vperm.xlu1 %3237, %v4122_v51   ;;  %1642 = vperm.xlu0 %3236, %v4100_v2  }
 0x202   :  { %1647 = vperm.xlu1 %3237, %v4107_v46  }
 0x206   :  { %1702 = vperm.xlu1 %3237, %v1337_v22   ;;  %v1635_v22 = vcvt.s32.f32 %v4791_v15 }
 0x22a   :  { %v3203_v57 = vpop.permute.xlu1 %3202 }
 0x22b   :  { %v3204_v33 = vunpack.i.l.bf16 %v3203_v57  ;;  %v3205_v3 = vunpack.i.h.bf16 %v3203_v57 }
 0x22f   :  { %v3208_v53 = vpop.permute.xlu0 %3207 }
 0x230   :  { %v3209_v4 = vunpack.i.l.bf16 %v3208_v53  ;;  %v3210_v55 = vunpack.i.h.bf16 %v3208_v53 }
 0x234   :  { %v3213_v42 = vpop.permute.xlu1 %3212 }
 0x235   :  { %v3214_v59 = vunpack.i.l.bf16 %v3213_v42  ;;  %v3215_v26 = vunpack.i.h.bf16 %v3213_v42 }
 0x238   :  { %v3218_v38 = vpop.permute.xlu0 %3217 }
 0x239   :  { %v3219_v31 = vunpack.i.l.bf16 %v3218_v38  ;;  %v3220_v9 = vunpack.i.h.bf16 %v3218_v38  ;;  %v1638_v38 = vadd.f32 1.0, %v1635_v22 }
 0x23c   :  { %v3223_v50 = vpop.permute.xlu1 %3222  ;;  %v1837_v25 = vpop.permute.xlu0 %1836 }
 0x23d   :  { %v1935_v61 = vsel %vm1934_vm11, 1.0, %v1837_v25  ;;  %v3224_v17 = vunpack.i.l.bf16 %v3223_v50  ;;  %v3225_v29 = vunpack.i.h.bf16 %v3223_v50 }
 0x23e   :  { %v1950_v43 = vsel %vm1949_vm12, %v1935_v61, %v3204_v33 }
 0x23f   :  { %1964 = vxpose.xlu1.b32.start [1/14] (short) (narrow) %v1950_v43, 8 }
 0x240   :  { %v1839_v45 = vpop.permute.xlu1 %1838  ;;  %v1847_v5 = vpop.permute.xlu0 %1846 }
 0x241   :  { %v1936_v2 = vsel %vm1934_vm11, 1.0, %v1839_v45  ;;  %v1940_v36 = vsel %vm1934_vm11, 1.0, %v1847_v5  ;;  %v4206_v45 = vmul.f32 0.06666667, %v1638_v38 }
 0x242   :  { %v1951_v46 = vsel %vm1949_vm12, %v1936_v2, %v3205_v3  ;;  %v1955_v18 = vsel %vm1949_vm12, %v1940_v36, %v3215_v26  ;;  %v4204_v3 = vmul.f32 0.06666667, %v1635_v22 }
 0x243   :  { %1965 = vxpose.xlu1.b32.cont [2/14] (short) (narrow) %v1951_v46, 8 }
 0x244   :  { %v1843_v35 = vpop.permute.xlu1 %1842  ;;  %v1845_v20 = vpop.permute.xlu0 %1844 }
 0x245   :  { %v1938_v0 = vsel %vm1934_vm11, 1.0, %v1843_v35  ;;  %v1939_v11 = vsel %vm1934_vm11, 1.0, %v1845_v20 }
 0x246   :  { %v1953_v58 = vsel %vm1949_vm12, %v1938_v0, %v3210_v55  ;;  %v1954_v21 = vsel %vm1949_vm12, %v1939_v11, %v3214_v59 }
 0x248   :  { %v1841_v56 = vpop.permute.xlu1 %1840  ;;  %v1855_v51 = vpop.permute.xlu0 %1854 }
 0x249   :  { %v1937_v19 = vsel %vm1934_vm11, 1.0, %v1841_v56  ;;  %v1944_v63 = vsel %vm1934_vm11, 1.0, %v1855_v51 }
 0x24a   :  { %v1952_v40 = vsel %vm1949_vm12, %v1937_v19, %v3209_v4  ;;  %v1959_v12 = vsel %vm1949_vm12, %v1944_v63, %v3225_v29 }
 0x24b   :  { %1966 = vxpose.xlu1.b32.cont [3/14] (short) (narrow) %v1952_v40, 8 }
 0x24c   :  { %v1851_v62 = vpop.permute.xlu1 %1850  ;;  %v1853_v14 = vpop.permute.xlu0 %1852 }
 0x24d   :  { %v1942_v30 = vsel %vm1934_vm11, 1.0, %v1851_v62  ;;  %v1943_v8 = vsel %vm1934_vm11, 1.0, %v1853_v14 }
 0x24e   :  { %v1957_v54 = vsel %vm1949_vm12, %v1942_v30, %v3220_v9  ;;  %v1958_v16 = vsel %vm1949_vm12, %v1943_v8, %v3224_v17 }
 0x24f   :  { %1967 = vxpose.xlu1.b32.cont [4/14] (short) (narrow) %v1953_v58, 8 }
 0x250   :  { %v1849_v34 = vpop.permute.xlu1 %1848  ;;  %v3228_v47 = vpop.permute.xlu0 %3227 }
 0x251   :  { %v1941_v48 = vsel %vm1934_vm11, 1.0, %v1849_v34  ;;  %v3229_v7 = vunpack.i.l.bf16 %v3228_v47  ;;  %v3230_v60 = vunpack.i.h.bf16 %v3228_v47 }
 0x252   :  { %v1956_v37 = vsel %vm1949_vm12, %v1941_v48, %v3219_v31 }
 0x253   :  { %1968 = vxpose.xlu1.b32.cont [5/14] (short) (narrow) %v1954_v21, 8 }
 0x254   :  { %v3233_v27 = vpop.permute.xlu1 %3232  ;;  %v1861_v32 = vpop.permute.xlu0 %1860 }
 0x255   :  { %v3234_v6 = vunpack.i.l.bf16 %v3233_v27  ;;  %v1947_v42 = vsel %vm1934_vm11, %v2651_v23, %v1861_v32  ;;  %v3235_v61 = vunpack.i.h.bf16 %v3233_v27 }
 0x257   :  { %1969 = vxpose.xlu1.b32.cont [6/14] (short) (narrow) %v1955_v18, 8  ;;  %v1962_v50 = vsel %vm1949_vm12, %v1947_v42, %v3234_v6  ;;  %v4804_v18 = vmov 1.0  }
 0x258   :  { %v1859_v13 = vpop.permute.xlu1 %1858  ;;  %v1863_v52 = vpop.permute.xlu0 %1862 }
 0x259   :  { %v1946_v39 = vsel %vm1934_vm11, 1.0, %v1859_v13  ;;  %v1948_v25 = vsel %vm1934_vm11, 0.0, %v1863_v52 }
 0x25a   :  { %v1961_v57 = vsel %vm1949_vm12, %v1946_v39, %v3230_v60  ;;  %v1963_v46 = vsel %vm1949_vm12, %v1948_v25, %v3235_v61 }
 0x25b   :  { %1970 = vxpose.xlu1.b32.cont [7/14] (short) (narrow) %v1956_v37, 8 }
 0x25c   :  { %v1857_v10 = vpop.permute.xlu1 %1856 }
 0x25d   :  { %v1945_v41 = vsel %vm1934_vm11, 1.0, %v1857_v10 }
 0x25e   :  { %v1960_v24 = vsel %vm1949_vm12, %v1945_v41, %v3229_v7 }
 0x25f   :  { %1971 = vxpose.xlu1.b32.cont [8/14] (short) (narrow) %v1957_v54, 8 }
 0x263   :  { %1972 = vxpose.xlu1.b32.cont [9/14] (short) (narrow) %v1958_v16, 8 }
 0x265   :  { %v1698_v53 = vpop.permute.xlu0 %1697 }
 0x266   :  { %vm1721_vm14 = vcmp.gt.f32.partialorder %v1698_v53, %v4204_v3  ;;  %vm1735_vm15 = vcmp.le.f32.partialorder %v1698_v53, %v4206_v45 }
 0x267   :  { %1973 = vxpose.xlu1.b32.cont [10/14] (short) (narrow) %v1959_v12, 8  ;;  %vm4215_vm2 = vmand %vm1721_vm14, %vm1735_vm15 }
 0x268   :  { %v2649_v40 = vsel %vm4215_vm2, 1.0, %v4734_v28 }
 0x269   :  { %v1693_v49 = vpop.permute.xlu1 %1692  ;;  %v1683_v43 = vpop.permute.xlu0 %1682  ;;  %v4245_v11 = vsub.f32 %v2649_v40, %v2649_v40 }
 0x26a   :  { %vm1720_vm0 = vcmp.gt.f32.partialorder %v1693_v49, %v4204_v3  ;;  %vm1734_vm1 = vcmp.le.f32.partialorder %v1693_v49, %v4206_v45  ;;  %vm1718_vm6 = vcmp.gt.f32.partialorder %v1683_v43, %v4204_v3  ;;  %vm1732_vm8 = vcmp.le.f32.partialorder %v1683_v43, %v4206_v45 }
 0x26b   :  { %1974 = vxpose.xlu1.b32.cont [11/14] (short) (narrow) %v1960_v24, 8  ;;  %vm4223_vm5 = vmand %vm1720_vm0, %vm1734_vm1  ;;  %v2110_v27 = vand.u32 4294901760, %v4245_v11 }
 0x26c   :  { %v2648_v20 = vsel %vm4223_vm5, 1.0, %v4734_v28  ;;  %vm4241_vm12 = vmand %vm1718_vm6, %vm1732_vm8 }
 0x26d   :  { %v1688_v1 = vpop.permute.xlu1 %1687  ;;  %v1673_v5 = vpop.permute.xlu0 %1672  ;;  %v4258_v51 = vsub.f32 %v2648_v20, %v2648_v20  ;;  %v2646_v36 = vsel %vm4241_vm12, 1.0, %v4734_v28  ;;  %v2111_v63 = vsub.f32 %v4245_v11, %v2110_v27 }
 0x26e   :  { %vm1719_vm3 = vcmp.gt.f32.partialorder %v1688_v1, %v4204_v3  ;;  %vm1733_vm4 = vcmp.le.f32.partialorder %v1688_v1, %v4206_v45  ;;  %vm1716_vm1 = vcmp.gt.f32.partialorder %v1673_v5, %v4204_v3  ;;  %v4295_v30 = vsub.f32 %v2646_v36, %v2646_v36 }
 0x26f   :  { %1975 = vxpose.xlu1.b32.cont [12/14] (short) (narrow) %v1961_v57, 8  ;;  %vm4234_vm11 = vmand %vm1719_vm3, %vm1733_vm4  ;;  %vm1730_vm3 = vcmp.le.f32.partialorder %v1673_v5, %v4206_v45  ;;  %v2117_v47 = vand.u32 4294901760, %v4258_v51  ;;  %v2112_v23 = vand.u32 4294901760, %v2111_v63 }
 0x270   :  { %v2647_v21 = vsel %vm4234_vm11, 1.0, %v4734_v28  ;;  %v2131_v52 = vand.u32 4294901760, %v4295_v30 }
 0x271   :  { %v1678_v33 = vpop.permute.xlu1 %1677  ;;  %v1663_v55 = vpop.permute.xlu0 %1662  ;;  %v4277_v44 = vsub.f32 %v2647_v21, %v2647_v21  ;;  %v2118_v49 = vsub.f32 %v4258_v51, %v2117_v47 }
 0x272   :  { %vm1717_vm9 = vcmp.gt.f32.partialorder %v1678_v33, %v4204_v3  ;;  %vm1731_vm10 = vcmp.le.f32.partialorder %v1678_v33, %v4206_v45  ;;  %v2132_v42 = vsub.f32 %v4295_v30, %v2131_v52 }
 0x273   :  { %1976 = vxpose.xlu1.b32.cont [13/14] (short) (narrow) %v1962_v50, 8  ;;  %vm4247_vm14 = vmand %vm1717_vm9, %vm1731_vm10  ;;  %vm1714_vm10 = vcmp.gt.f32.partialorder %v1663_v55, %v4204_v3  ;;  %v2124_v29 = vand.u32 4294901760, %v4277_v44  ;;  %v2119_v53 = vand.u32 4294901760, %v2118_v49 }
 0x274   :  { %v2645_v37 = vsel %vm4247_vm14, 1.0, %v4734_v28 }
 0x275   :  { %v1668_v2 = vpop.permute.xlu1 %1667  ;;  %v1653_v31 = vpop.permute.xlu0 %1652  ;;  %v4316_v8 = vsub.f32 %v2645_v37, %v2645_v37  ;;  %v2125_v15 = vsub.f32 %v4277_v44, %v2124_v29 }
 0x276   :  { %vm1715_vm8 = vcmp.gt.f32.partialorder %v1668_v2, %v4204_v3  ;;  %vm1729_vm9 = vcmp.le.f32.partialorder %v1668_v2, %v4206_v45 }
 0x277   :  { %1977 = vxpose.xlu1.b32.end [14/14] (short) (narrow) %v1963_v46, 8  ;;  %v2138_v22 = vand.u32 4294901760, %v4316_v8  ;;  %v2126_v61 = vand.u32 4294901760, %v2125_v15  ;;  %v2133_v46 = vand.u32 4294901760, %v2132_v42 }
 0x279   :  { %v4211_v35 = vpop.permute.xlu1 %1657  ;;  %v1643_v41 = vpop.permute.xlu0 %1642  ;;  %v2139_v43 = vsub.f32 %v4316_v8, %v2138_v22 }
 0x27a   :  { %vm1710_vm13 = vcmp.gt.f32.partialorder %v1643_v41, %v4204_v3 }
 0x27d   :  { %v4221_v56 = vpop.permute.xlu1 %1647 }
 0x281   :  { %v1703_v58 = vpop.permute.xlu1 %1702 }
 0x282   :  { %vm1722_vm15 = vcmp.gt.f32.partialorder %v1703_v58, %v4204_v3  ;;  %vm1736_vm0 = vcmp.le.f32.partialorder %v1703_v58, %v4206_v45 }
 0x283   :  { %vm1750_vm4 = vmand %vm1722_vm15, %vm1736_vm0  ;;  %vm1728_vm15 = vcmp.le.f32.partialorder %v1663_v55, %v4206_v45  ;;  %v2140_v55 = vand.u32 4294901760, %v2139_v43 }
 0x284   :  { %vm4262_vm6 = vmand %vm1750_vm4, %vm159_vm7 }
 0x285   :  { %v2650_v26 = vsel %vm4262_vm6, 1.0, %v4734_v28  ;;  %3022 = vmatpush3.msk.msra.mxu0 %vm4262_vm6, %v4804_v18  ;;  %vm4279_vm7 = vmand %vm1716_vm1, %vm1730_vm3  ;;  %vm1713_vm1 = vcmp.gt.f32.partialorder %v4211_v35, %v4204_v3  ;;  %vm1727_vm3 = vcmp.le.f32.partialorder %v4211_v35, %v4206_v45 }
 0x286   :  { %v4283_v14 = vsub.f32 %v2650_v26, %v2650_v26  ;;  %3023 = vmatprep.subr.mxu0 %v4734_v28  ;;  %vm4299_vm0 = vmand %vm1715_vm8, %vm1729_vm9  ;;  %v2644_v13 = vsel %vm4279_vm7, 1.0, %v4734_v28  ;;  %vm1712_vm8 = vcmp.gt.f32.partialorder %v1653_v31, %v4204_v3  ;;  %vm1726_vm9 = vcmp.le.f32.partialorder %v1653_v31, %v4206_v45 }
 0x287   :  { %3024 = vmatpush3.msk.msra.mxu0 %vm4215_vm2, %v4804_v18  ;;  %vm4318_vm4 = vmand %vm1714_vm10, %vm1728_vm15  ;;  %v2643_v32 = vsel %vm4299_vm0, 1.0, %v4734_v28  ;;  %v4338_v10 = vsub.f32 %v2644_v13, %v2644_v13  ;;  %vm1711_vm15 = vcmp.gt.f32.partialorder %v4221_v56, %v4204_v3 }
 0x288   :  { %3025 = vmatprep.subr.mxu0 %v4734_v28  ;;  %v2103_v54 = vand.u32 4294901760, %v4283_v14  ;;  %vm4340_vm10 = vmand %vm1713_vm1, %vm1727_vm3  ;;  %v2642_v24 = vsel %vm4318_vm4, 1.0, %v4734_v28  ;;  %vm1725_vm1 = vcmp.le.f32.partialorder %v4221_v56, %v4206_v45  ;;  %v4359_v39 = vsub.f32 %v2643_v32, %v2643_v32 }
 0x289   :  { %3026 = vmatpush3.msk.msra.mxu0 %vm4223_vm5, %v4804_v18  ;;  %vm4363_vm3 = vmand %vm1712_vm8, %vm1726_vm9  ;;  %v2641_v1 = vsel %vm4340_vm10, 1.0, %v4734_v28  ;;  %vm1724_vm8 = vcmp.le.f32.partialorder %v1643_v41, %v4206_v45  ;;  %v4381_v6 = vsub.f32 %v2642_v24, %v2642_v24  ;;  %v2145_v38 = vand.u32 4294901760, %v4338_v10 }
 0x28a   :  { %3027 = vmatprep.subr.mxu0 %v4734_v28  ;;  %v2104_v16 = vsub.f32 %v4283_v14, %v2103_v54  ;;  %vm4389_vm9 = vmand %vm1711_vm15, %vm1725_vm1  ;;  %v2640_v33 = vsel %vm4363_vm3, 1.0, %v4734_v28  ;;  %v4405_v50 = vsub.f32 %v2641_v1, %v2641_v1  ;;  %v2152_v45 = vand.u32 4294901760, %v4359_v39 }
 0x28b   :  { %3028 = vmatpush3.msk.msra.mxu0 %vm4234_vm11, %v4804_v18  ;;  %vm4409_vm15 = vmand %vm1710_vm13, %vm1724_vm8  ;;  %v2639_v2 = vsel %vm4389_vm9, 1.0, %v4734_v28  ;;  %v4425_v3 = vsub.f32 %v2640_v33, %v2640_v33  ;;  %v2146_v35 = vsub.f32 %v4338_v10, %v2145_v38  ;;  %v2159_v5 = vand.u32 4294901760, %v4381_v6 }
 0x28c   :  { %3029 = vmatprep.subr.mxu0 %v4734_v28  ;;  %v2105_v7 = vand.u32 4294901760, %v2104_v16  ;;  %v2638_v56 = vsel %vm4409_vm15, 1.0, %v4734_v28  ;;  %v4439_v40 = vsub.f32 %v2639_v2, %v2639_v2  ;;  %v2153_v20 = vsub.f32 %v4359_v39, %v2152_v45 }
 0x28d   :  { %3030 = vmatpush3.msk.msra.mxu0 %vm4241_vm12, %v4804_v18  ;;  %v2166_v58 = vand.u32 4294901760, %v4405_v50  ;;  %v4450_v21 = vsub.f32 %v2638_v56, %v2638_v56  ;;  %v2147_v36 = vand.u32 4294901760, %v2146_v35  ;;  %v2160_v26 = vsub.f32 %v4381_v6, %v2159_v5 }
 0x28e   :  { %3031 = vmatprep.subr.mxu0 %v4734_v28  ;;  %3051 = vmatpush3.msra.mxu1 %v2105_v7  ;;  %v2173_v31 = vand.u32 4294901760, %v4425_v3  ;;  %v2154_v37 = vand.u32 4294901760, %v2153_v20  ;;  %v2180_v16 = vand.u32 4294901760, %v4439_v40  ;;  %vm1996_vm13 = vcmask 916480  }
 0x28f   :  { %3032 = vmatpush3.msk.msra.mxu0 %vm4247_vm14, %v4804_v18  ;;  %3052 = vmatprep.subr.mxu1 %v4734_v28  ;;  %v2167_v13 = vsub.f32 %v4405_v50, %v2166_v58  ;;  %v2161_v63 = vand.u32 4294901760, %v2160_v26  ;;  %v2187_v41 = vand.u32 4294901760, %v4450_v21  ;;  %vm4819_vm1 = vmmov 0  }
 0x290   :  { %3033 = vmatprep.subr.mxu0 %v4734_v28  ;;  %3053 = vmatpush3.msra.mxu1 %v2112_v23  ;;  %v2174_v32 = vsub.f32 %v4425_v3, %v2173_v31  ;;  %v2181_v49 = vsub.f32 %v4439_v40, %v2180_v16 }
 0x291   :  { %3034 = vmatpush3.msk.msra.mxu0 %vm4279_vm7, %v4804_v18  ;;  %3054 = vmatprep.subr.mxu1 %v4734_v28  ;;  %v2168_v7 = vand.u32 4294901760, %v2167_v13  ;;  %v2188_v23 = vsub.f32 %v4450_v21, %v2187_v41 }
 0x292   :  { %3035 = vmatprep.subr.mxu0 %v4734_v28  ;;  %3055 = vmatpush3.msra.mxu1 %v2119_v53  ;;  %v2175_v24 = vand.u32 4294901760, %v2174_v32  ;;  %v2182_v15 = vand.u32 4294901760, %v2181_v49 }
 0x293   :  { %3036 = vmatpush3.msk.msra.mxu0 %vm4299_vm0, %v4804_v18  ;;  %3056 = vmatprep.subr.mxu1 %v4734_v28  ;;  %v2189_v1 = vand.u32 4294901760, %v2188_v23 }
 0x294   :  { %3037 = vmatprep.subr.mxu0 %v4734_v28  ;;  %3057 = vmatpush3.msra.mxu1 %v2126_v61 }
 0x295   :  { %3038 = vmatpush3.msk.msra.mxu0 %vm4318_vm4, %v4804_v18  ;;  %3058 = vmatprep.subr.mxu1 %v4734_v28 }
 0x296   :  { %3039 = vmatprep.subr.mxu0 %v4734_v28  ;;  %3059 = vmatpush3.msra.mxu1 %v2133_v46 }
 0x297   :  { %3040 = vmatpush3.msk.msra.mxu0 %vm4340_vm10, %v4804_v18  ;;  %3060 = vmatprep.subr.mxu1 %v4734_v28 }
 0x298   :  { %3041 = vmatprep.subr.mxu0 %v4734_v28  ;;  %3061 = vmatpush3.msra.mxu1 %v2140_v55 }
 0x299   :  { %3042 = vmatpush3.msk.msra.mxu0 %vm4363_vm3, %v4804_v18  ;;  %3062 = vmatprep.subr.mxu1 %v4734_v28 }
 0x29a   :  { %3043 = vmatprep.subr.mxu0 %v4734_v28  ;;  %3063 = vmatpush3.msra.mxu1 %v2147_v36 }
 0x29b   :  { %3044 = vmatpush3.msk.msra.mxu0 %vm4389_vm9, %v4804_v18  ;;  %3064 = vmatprep.subr.mxu1 %v4734_v28 }
 0x29c   :  { %3045 = vmatprep.subr.mxu0 %v4734_v28  ;;  %3065 = vmatpush3.msra.mxu1 %v2154_v37 }
 0x29d   :  { %3046 = vmatpush3.msk.msra.mxu0 %vm4409_vm15, %v4804_v18  ;;  %3066 = vmatprep.subr.mxu1 %v4734_v28 }
 0x29e   :  { %3067 = vmatpush3.msra.mxu1 %v2161_v63  ;;  %3079 = vmatprep.subr.mxu0 %v4734_v28 }
 0x29f   :  { %3068 = vmatprep.subr.mxu1 %v4734_v28 }
 0x2a0   :  { %3069 = vmatpush3.msra.mxu1 %v2168_v7 }
 0x2a1   :  { %3070 = vmatprep.subr.mxu1 %v4734_v28 }
 0x2a2   :  { %3071 = vmatpush3.msra.mxu1 %v2175_v24 }
 0x2a3   :  { %3072 = vmatprep.subr.mxu1 %v4734_v28 }
 0x2a4   :  { %3073 = vmatpush3.msra.mxu1 %v2182_v15 }
 0x2a5   :  { %3074 = vmatprep.subr.mxu1 %v4734_v28 }
 0x2a6   :  { %3075 = vmatpush3.msra.mxu1 %v2189_v1 }
 0x2a7   :  { %3108 = vmatprep.subr.mxu1 %v4734_v28 }
 0x2bf   :  { %v1980_v53 = vpop.trf.xlu1 }
 0x2c0   :  { %v1998_v42 = vsel %vm1996_vm13, %v1980_v53, 0 }
 0x2c1   :  { %v4491_v33 = vand.u32 4294901760, %v1998_v42 }
 0x2c3   :  { %v4494_v61 = vsub.f32 %v1998_v42, %v4491_v33  ;;  %3077 = vmatmul.mubr.f32.vlgmr.msra.gmra.mxu1 %v4491_v33 }
 0x2c4   :  { %3109 = vmatpush3.msk.msra.mxu1 %vm4262_vm6, %v4804_v18  ;;  %3134 = vmatprep.mubr.msk.f32.mxu1 %vm4819_vm1, %v4734_v28 }
 0x2c5   :  { %v2081_v43 = vand.u32 4294901760, %v4494_v61  ;;  %3110 = vmatprep.subr.mxu1 %v4734_v28 }
 0x2c6   :  { %3111 = vmatpush3.msk.msra.mxu1 %vm4215_vm2, %v4804_v18 }
 0x2c7   :  { %v2082_v2 = vsub.f32 %v4494_v61, %v2081_v43  ;;  %3112 = vmatprep.subr.mxu1 %v4734_v28 }
 0x2c8   :  { %3113 = vmatpush3.msk.msra.mxu1 %vm4223_vm5, %v4804_v18 }
 0x2c9   :  { %v2083_v46 = vand.u32 4294901760, %v2082_v2  ;;  %3114 = vmatprep.subr.mxu1 %v4734_v28 }
 0x2ca   :  { %3115 = vmatpush3.msk.msra.mxu1 %vm4234_vm11, %v4804_v18 }
 0x2cb   :  { %3116 = vmatprep.subr.mxu1 %v4734_v28  ;;  %3048 = vmatmul.mubr.f32.vlgmr.msra.gmra.mxu0 %v2083_v46 }
 0x2cc   :  { %3080 = vmatpush3.msra.mxu0 %v4283_v14  ;;  %3117 = vmatpush3.msk.msra.mxu1 %vm4241_vm12, %v4804_v18 }
 0x2cd   :  { %3081 = vmatprep.subr.mxu0 %v4734_v28  ;;  %3118 = vmatprep.subr.mxu1 %v4734_v28 }
 0x2ce   :  { %3082 = vmatpush3.msra.mxu0 %v4245_v11  ;;  %3119 = vmatpush3.msk.msra.mxu1 %vm4247_vm14, %v4804_v18 }
 0x2cf   :  { %3083 = vmatprep.subr.mxu0 %v4734_v28  ;;  %3120 = vmatprep.subr.mxu1 %v4734_v28 }
 0x2d0   :  { %3084 = vmatpush3.msra.mxu0 %v4258_v51  ;;  %3121 = vmatpush3.msk.msra.mxu1 %vm4279_vm7, %v4804_v18 }
 0x2d1   :  { %3085 = vmatprep.subr.mxu0 %v4734_v28  ;;  %3122 = vmatprep.subr.mxu1 %v4734_v28 }
 0x2d2   :  { %3086 = vmatpush3.msra.mxu0 %v4277_v44  ;;  %3123 = vmatpush3.msk.msra.mxu1 %vm4299_vm0, %v4804_v18 }
 0x2d3   :  { %3087 = vmatprep.subr.mxu0 %v4734_v28  ;;  %3124 = vmatprep.subr.mxu1 %v4734_v28 }
 0x2d4   :  { %3088 = vmatpush3.msra.mxu0 %v4295_v30  ;;  %3125 = vmatpush3.msk.msra.mxu1 %vm4318_vm4, %v4804_v18 }
 0x2d5   :  { %3089 = vmatprep.subr.mxu0 %v4734_v28  ;;  %3126 = vmatprep.subr.mxu1 %v4734_v28 }
 0x2d6   :  { %3090 = vmatpush3.msra.mxu0 %v4316_v8  ;;  %3127 = vmatpush3.msk.msra.mxu1 %vm4340_vm10, %v4804_v18 }
 0x2d7   :  { %3091 = vmatprep.subr.mxu0 %v4734_v28  ;;  %3128 = vmatprep.subr.mxu1 %v4734_v28 }
 0x2d8   :  { %3092 = vmatpush3.msra.mxu0 %v4338_v10  ;;  %3129 = vmatpush3.msk.msra.mxu1 %vm4363_vm3, %v4804_v18 }
 0x2d9   :  { %3093 = vmatprep.subr.mxu0 %v4734_v28  ;;  %3130 = vmatprep.subr.mxu1 %v4734_v28 }
 0x2da   :  { %3094 = vmatpush3.msra.mxu0 %v4359_v39  ;;  %3131 = vmatpush3.msk.msra.mxu1 %vm4389_vm9, %v4804_v18 }
 0x2db   :  { %3095 = vmatprep.subr.mxu0 %v4734_v28  ;;  %3132 = vmatprep.subr.mxu1 %v4734_v28 }
 0x2dc   :  { %3096 = vmatpush3.msra.mxu0 %v4381_v6  ;;  %3133 = vmatpush3.msk.msra.mxu1 %vm4409_vm15, %v4804_v18 }
 0x2dd   :  { %3097 = vmatprep.subr.mxu0 %v4734_v28  ;;  %3135 = vmatmul.mubr.f32.vlgmr.msra.gmra.mxu1 %v2081_v43 }
 0x2de   :  { %3166 = vmatprep.subr.mxu1 %v4734_v28  ;;  %3098 = vmatpush3.msra.mxu0 %v4405_v50 }
 0x2df   :  { %3167 = vmatpush3.msk.msra.mxu1 %vm4262_vm6, %v4804_v18  ;;  %3099 = vmatprep.subr.mxu0 %v4734_v28 }
 0x2e0   :  { %3168 = vmatprep.subr.mxu1 %v4734_v28  ;;  %3100 = vmatpush3.msra.mxu0 %v4425_v3 }
 0x2e1   :  { %3169 = vmatpush3.msk.msra.mxu1 %vm4215_vm2, %v4804_v18  ;;  %3101 = vmatprep.subr.mxu0 %v4734_v28  ;;  %vm99_vm2 = vcmask 116736  }
 0x2e2   :  { %3170 = vmatprep.subr.mxu1 %v4734_v28  ;;  %3102 = vmatpush3.msra.mxu0 %v4439_v40  ;;  %100 = vst.msk [vmem:[%s4691_s2] sm:$0x7] %vm99_vm2, %v4734_v28 }
 0x2e3   :  { %3171 = vmatpush3.msk.msra.mxu1 %vm4223_vm5, %v4804_v18  ;;  %3103 = vmatprep.subr.mxu0 %v4734_v28 }
 0x2e4   :  { %3172 = vmatprep.subr.mxu1 %v4734_v28  ;;  %3104 = vmatpush3.msra.mxu0 %v4450_v21 }
 0x2e5   :  { %3105 = vmatprep.mubr.msk.f32.mxu0 %vm4819_vm1, %v4734_v28  ;;  %3173 = vmatpush3.msk.msra.mxu1 %vm4234_vm11, %v4804_v18 }
 0x2e6   :  { %3106 = vmatmul.mubr.f32.vlgmr.msra.gmra.mxu0 %v4494_v61  ;;  %3137 = vmatprep.subr.mxu0 %v4734_v28 }
 0x2e7   :  { %3174 = vmatprep.subr.mxu1 %v4734_v28  ;;  %3138 = vmatpush3.msra.mxu0 %v2103_v54 }
 0x2e8   :  { %3175 = vmatpush3.msk.msra.mxu1 %vm4241_vm12, %v4804_v18  ;;  %3139 = vmatprep.subr.mxu0 %v4734_v28 }
 0x2e9   :  { %3176 = vmatprep.subr.mxu1 %v4734_v28  ;;  %3140 = vmatpush3.msra.mxu0 %v2110_v27  ;;  %v2615_v54 = vld [vmem:[%s4691_s2] sm:$0x7] }
 0x2ea   :  { %3177 = vmatpush3.msk.msra.mxu1 %vm4247_vm14, %v4804_v18  ;;  %3141 = vmatprep.subr.mxu0 %v4734_v28 }
 0x2eb   :  { %3178 = vmatprep.subr.mxu1 %v4734_v28  ;;  %3142 = vmatpush3.msra.mxu0 %v2117_v47 }
 0x2ec   :  { %3179 = vmatpush3.msk.msra.mxu1 %vm4279_vm7, %v4804_v18  ;;  %3143 = vmatprep.subr.mxu0 %v4734_v28 }
 0x2ed   :  { %3180 = vmatprep.subr.mxu1 %v4734_v28  ;;  %3144 = vmatpush3.msra.mxu0 %v2124_v29 }
 0x2ee   :  { %3181 = vmatpush3.msk.msra.mxu1 %vm4299_vm0, %v4804_v18  ;;  %3145 = vmatprep.subr.mxu0 %v4734_v28 }
 0x2ef   :  { %3182 = vmatprep.subr.mxu1 %v4734_v28  ;;  %3146 = vmatpush3.msra.mxu0 %v2131_v52 }
 0x2f0   :  { %3183 = vmatpush3.msk.msra.mxu1 %vm4318_vm4, %v4804_v18  ;;  %3147 = vmatprep.subr.mxu0 %v4734_v28 }
 0x2f1   :  { %3184 = vmatprep.subr.mxu1 %v4734_v28  ;;  %3148 = vmatpush3.msra.mxu0 %v2138_v22 }
 0x2f2   :  { %3185 = vmatpush3.msk.msra.mxu1 %vm4340_vm10, %v4804_v18  ;;  %3149 = vmatprep.subr.mxu0 %v4734_v28 }
 0x2f3   :  { %3186 = vmatprep.subr.mxu1 %v4734_v28  ;;  %3150 = vmatpush3.msra.mxu0 %v2145_v38 }
 0x2f4   :  { %3187 = vmatpush3.msk.msra.mxu1 %vm4363_vm3, %v4804_v18  ;;  %3151 = vmatprep.subr.mxu0 %v4734_v28 }
 0x2f5   :  { %3188 = vmatprep.subr.mxu1 %v4734_v28  ;;  %3152 = vmatpush3.msra.mxu0 %v2152_v45 }
 0x2f6   :  { %3189 = vmatpush3.msk.msra.mxu1 %vm4389_vm9, %v4804_v18  ;;  %3153 = vmatprep.subr.mxu0 %v4734_v28 }
 0x2f7   :  { %3190 = vmatprep.subr.mxu1 %v4734_v28  ;;  %3154 = vmatpush3.msra.mxu0 %v2159_v5 }
 0x2f8   :  { %3191 = vmatpush3.msk.msra.mxu1 %vm4409_vm15, %v4804_v18  ;;  %3192 = vmatprep.mubr.msk.f32.mxu1 %vm4819_vm1, %v4734_v28 }
 0x2f9   :  { %3155 = vmatprep.subr.mxu0 %v4734_v28  ;;  %3193 = vmatmul.mubr.f32.vlgmr.msra.gmra.mxu1 %v4491_v33 }
 0x2fa   :  { %3156 = vmatpush3.msra.mxu0 %v2166_v58  ;;  %3163 = vmatprep.mubr.msk.f32.mxu0 %vm4819_vm1, %v4734_v28 }
 0x2fb   :  { %3157 = vmatprep.subr.mxu0 %v4734_v28 }
 0x2fc   :  { %3158 = vmatpush3.msra.mxu0 %v2173_v31 }
 0x2fd   :  { %3159 = vmatprep.subr.mxu0 %v4734_v28 }
 0x2fe   :  { %3160 = vmatpush3.msra.mxu0 %v2180_v16 }
 0x2ff   :  { %3161 = vmatprep.subr.mxu0 %v4734_v28 }
 0x300   :  { %3162 = vmatpush3.msra.mxu0 %v2187_v41 }
 0x301   :  { %3164 = vmatmul.mubr.f32.vlgmr.msra.gmra.mxu0 %v4491_v33 }
 0x383   :  { %v2226_v4 = vpop.f32.mrf.mxu1 }
 0x385   :  { %v3078_v19 = vpop.f32.mrf.mxu1 }
 0x38b   :  { %v2085_v0 = vpop.f32.mrf.mxu0 }
 0x38c   :  { %v2227_v44 = vadd.f32 %v2226_v4, %v2085_v0 }
 0x38d   :  { %v3049_v62 = vpop.f32.mrf.mxu0 }
 0x39d   :  { %v2413_v11 = vpop.f32.mrf.mxu1 }
 0x39f   :  { %v3136_v59 = vpop.f32.mrf.mxu1 }
 0x3a6   :  { %v2326_v51 = vpop.f32.mrf.mxu0 }
 0x3a7   :  { %v2327_v14 = vadd.f32 %v2326_v51, %v2227_v44 }
 0x3a8   :  { %v3107_v34 = vpop.f32.mrf.mxu0 }
 0x3a9   :  { %v2414_v27 = vadd.f32 %v2413_v11, %v2327_v14 }
 0x3b9   :  { %v2611_v18 = vpop.f32.mrf.mxu1 }
 0x3bb   :  { %v3194_v48 = vpop.f32.mrf.mxu1 }
 0x3c1   :  { %v2526_v30 = vpop.f32.mrf.mxu0 }
 0x3c2   :  { %v2527_v9 = vadd.f32 %v2526_v30, %v2414_v27 }
 0x3c3   :  { %v3165_v28 = vpop.f32.mrf.mxu0 }
 0x3c4   :  { %v2612_v47 = vadd.f32 %v2611_v18, %v2527_v9 }
 0x3c6   :  { %v2616_v8 = vadd.f32 %v2615_v54, %v2612_v47 }
 0x3c8   :  { %2618 = vst.msk [vmem:[%s4691_s2] sm:$0x7] %vm99_vm2, %v2616_v8 }

</bundles_post_ra>
